<compile_context>
chip_gen: v7x
topology: tpu7x:2x2x1
jax: 0.10.0
libtpu: 0.0.40
codegen_flags: <defaults>
</compile_context>

<pallas_src>
import functools
import math

import jax
import jax.numpy as jnp
from jax.experimental import pallas as pl
from jax.experimental.pallas import tpu as pltpu

# ---------------- configuration (small, deterministic) ----------------
ADIM = 32           # scalar feature channels ("adim")
HEADS = 2           # config['heads']
N_BLOCKS = 4        # Sequential(Block, Block, Block, Block)
R_CUT = 1.2
BOX = (4.0, 4.0, 4.0)
NEIGHBOURS_MAX = 64
N_RADIAL = 8        # radial_encode(r, 8, r_cut)
LEAK = 0.2          # LeakyReLU slope used by the MLPs

ANG_BOX = tuple(b / (2.0 * math.pi) for b in BOX)


# =====================================================================
# Fused Pallas kernel: whole Discriminator forward (scalar path)
# =====================================================================
def _fused_kernel(batch, nodes, heads,
                  d_ref, slab_ref, w_ref, b_ref, out_ref):
    """Flat over batch*nodes (= BN).

    d_ref   : (BN, 8)      pos1 - pos0, zero-padded to 8 lanes (MXU friendly)
    slab_ref: (4, BN, K)   components 0..2 = (nbr - pos0)/ang_box, component 3 = mask
    w_ref   : (80, ADIM)   [w1_pad(8) ; w2(32) ; wea_comb(8) ; wout_pad(32)]
    b_ref   : (1, 4*ADIM)  [b1 | b2 | bea_comb | bout_pad]
    out_ref : (B, heads)
    """
    A = ADIM

    ws = w_ref[...]                       # (80, A) -- 8-aligned static sublane slices
    w1 = ws[0:8, :]                       # (8, A)
    w2 = ws[8:8 + A, :]                   # (A, A)
    wea = ws[8 + A:16 + A, :]             # (8, A)  combined 4-block emb_a weights
    wout = ws[16 + A:16 + 2 * A, 0:heads]  # (A, heads)

    biases = b_ref[...]                   # (1, 4A)
    b1 = biases[:, 0:A]
    b2 = biases[:, A:2 * A]
    bea = biases[:, 2 * A:3 * A]
    bout = biases[:, 3 * A:3 * A + heads]

    # ---- NodeRelativeEmbedMLP stand-in (scalar branch), on the MXU ----
    h = jnp.dot(d_ref[...], w1, preferred_element_type=jnp.float32) + b1
    h = jnp.where(h > 0, h, LEAK * h)
    x_a = jnp.dot(h, w2, preferred_element_type=jnp.float32) + b2      # (BN, A)

    # ---- GraphEmbedLayer (no parameters -> computed once, shared by all blocks) ----
    slab = slab_ref[...]                                               # (4, BN, K)
    s = jnp.sin(slab[0:3])                 # ONE EUP launch over all 3 components
    s2 = s * s
    # ang_f^2 / r_cut^2 folded into static python-float coefficients
    c0 = ANG_BOX[0] ** 2 / (R_CUT * R_CUT)
    c1 = ANG_BOX[1] ** 2 / (R_CUT * R_CUT)
    c2 = ANG_BOX[2] ** 2 / (R_CUT * R_CUT)
    d2 = c0 * s2[0] + c1 * s2[1] + c2 * s2[2]                           # (BN, K)
    mask = slab[3]                                                      # (BN, K)

    # ---- radial_encode stand-in (Gaussian RBF), decomposed to 2 exps/edge ----
    #   exp(-8*(d2-c_k)^2) = exp(-8*d2^2) * exp(2*d2)^k * exp(-8*c_k^2), c_k = k/8
    base = jnp.exp(-8.0 * d2 * d2) * mask   # mask on the base term -> padded edges = 0
    t = jnp.exp(2.0 * d2)
    cols = []
    p = base
    for kk in range(N_RADIAL):
        c_k = kk / N_RADIAL
        cols.append(jnp.sum(p, axis=1, keepdims=True) * math.exp(-8.0 * c_k * c_k))
        if kk + 1 < N_RADIAL:
            p = p * t                       # running VPU multiply
    emb_a = jnp.concatenate(cols, axis=1)                               # (BN, 8)

    # ---- collapsed 4-block recursion (scalar path is exactly linear) ----
    #   x_out = 16*x_a + emb_a @ (8W0+4W1+2W2+W3) + (8b0+4b1+2b2+b3)
    x_a = 16.0 * x_a + jnp.dot(emb_a, wea, preferred_element_type=jnp.float32) + bea

    # ---- head: lin_out(y_a.mean(1)) ----
    # B=2: two static 8-aligned sublane slices; for larger B reshape to (B,N,A)
    # and reduce axis 1 instead (keeps the epilogue O(1) in instructions).
    sums = [jnp.sum(x_a[b * nodes:(b + 1) * nodes], axis=0, keepdims=True)
            for b in range(batch)]
    means = jnp.concatenate(sums, axis=0) * (1.0 / nodes)               # (B, A)
    out_ref[...] = jnp.dot(means, wout, preferred_element_type=jnp.float32) + bout


def fused_discriminator(d_pad, edge_slab, w_slab, b_slab, *, batch, nodes, heads):
    bn = batch * nodes
    k = edge_slab.shape[-1]
    full = lambda shape: pl.BlockSpec(shape, lambda i: (0,) * len(shape))
    return pl.pallas_call(
        functools.partial(_fused_kernel, batch, nodes, heads),
        out_shape=jax.ShapeDtypeStruct((batch, heads), jnp.float32),
        grid=(1,),
        in_specs=[
            full((bn, 8)),                     # d_pad
            full((4, bn, k)),                  # scaled relative edges + mask
            full((8 + ADIM + 8 + ADIM, ADIM)),  # weight slab
            full((1, 4 * ADIM)),               # bias slab
        ],
        out_specs=full((batch, heads)),
        compiler_params=pltpu.CompilerParams(dimension_semantics=("arbitrary",)),
    )(d_pad, edge_slab, w_slab, b_slab)


# =====================================================================
# Glue: periodic radius graph (data-dependent top-k gather stays in plain JAX)
# =====================================================================
def radius_graph(pos, r_cut, box, k_max):
    B, N, _ = pos.shape
    box_arr = jnp.asarray(box, dtype=pos.dtype)
    disp = pos[:, :, None, :] - pos[:, None, :, :]
    disp = disp - box_arr * jnp.round(disp / box_arr)            # minimum image
    dist2 = jnp.sum(disp * disp, axis=-1)                        # (B, N, N)
    eye = jnp.eye(N, dtype=bool)[None]
    valid = (dist2 < r_cut * r_cut) & (~eye)
    key = jnp.where(valid, dist2, jnp.inf)
    k = min(k_max, N)
    order = jnp.argsort(key, axis=-1)[:, :, :k]                  # (B, N, K)
    mask = jnp.take_along_axis(valid, order, axis=-1)
    return order, mask.astype(jnp.float32)


@jax.jit
def discriminator_forward(params, pos_0, pos_1):
    B, N, _ = pos_0.shape
    idx, mask = radius_graph(pos_0, R_CUT, BOX, NEIGHBOURS_MAX)
    nbr = jax.vmap(lambda p, ix: p[ix])(pos_0, idx)              # (B, N, K, 3)
    K = nbr.shape[2]

    # edges_read(graph,pos) - pos[:,:,None] and the 1/ang_box scale fuse into the
    # gather here (one XLA fusion); the kernel sees a single lane-dense edge slab.
    ang = jnp.asarray(ANG_BOX, dtype=jnp.float32)
    edges_scaled = (nbr - pos_0[:, :, None, :]) / ang            # (B, N, K, 3)
    edges_cf = jnp.transpose(edges_scaled, (3, 0, 1, 2)).reshape(3, B * N, K)
    edge_slab = jnp.concatenate([edges_cf, mask.reshape(1, B * N, K)], axis=0)

    d = (pos_1 - pos_0).reshape(B * N, 3)
    d_pad = jnp.pad(d, ((0, 0), (0, 8 - 3)))                     # (BN, 8)

    # ---- parameter packing: 2 consolidated DMA slabs ----
    w1, b1, w2, b2 = params["node_enc"]
    w1_pad = jnp.pad(w1, ((0, 8 - 3), (0, 0)))                   # (8, A)
    coefs = (8.0, 4.0, 2.0, 1.0)
    wea_comb = sum(c * wb[0] for c, wb in zip(coefs, params["blocks"]))  # (8, A)
    bea_comb = sum(c * wb[1] for c, wb in zip(coefs, params["blocks"]))  # (1, A)
    wout, bout = params["lin_out"]
    heads = wout.shape[1]
    wout_pad = jnp.pad(wout, ((0, 0), (0, ADIM - heads)))        # (A, A)
    bout_pad = jnp.pad(bout, ((0, 0), (0, ADIM - heads)))        # (1, A)
    w_slab = jnp.concatenate([w1_pad, w2, wea_comb, wout_pad], axis=0)   # (80, A)
    b_slab = jnp.concatenate([b1, b2, bea_comb, bout_pad], axis=1)       # (1, 4A)

    return fused_discriminator(d_pad, edge_slab, w_slab, b_slab,
                               batch=B, nodes=N, heads=heads)


# =====================================================================
# Pure-JAX reference (same math, natural layouts, no algebraic collapse)
# =====================================================================
def ref_forward(params, pos_0, pos_1):
    idx, mask = radius_graph(pos_0, R_CUT, BOX, NEIGHBOURS_MAX)
    nbr = jax.vmap(lambda p, ix: p[ix])(pos_0, idx)
    d = pos_1 - pos_0
    w1, b1, w2, b2 = params["node_enc"]
    pre = d @ w1 + b1
    h = jnp.where(pre > 0, pre, LEAK * pre)
    x_a = h @ w2 + b2                                            # (B, N, A)

    ang = jnp.asarray(ANG_BOX, dtype=jnp.float32)
    edges = nbr - pos_0[:, :, None, :]
    edges = ang * jnp.sin(edges / ang)
    r = jnp.sum(edges ** 2, axis=-1)
    d2 = r / (R_CUT * R_CUT)
    ks = jnp.arange(N_RADIAL, dtype=jnp.float32) / N_RADIAL
    x = jnp.exp(-8.0 * (d2[..., None] - ks) ** 2) * mask[..., None]
    emb_a = jnp.sum(x, axis=2)                                   # (B, N, 8)
    for (wea, bea) in params["blocks"]:
        y_a = x_a + emb_a @ wea + bea
        x_a = x_a + y_a
    wout, bout = params["lin_out"]
    return jnp.mean(x_a, axis=1) @ wout + bout


# =====================================================================
# Deterministic parameter init
# =====================================================================
def init_params(key):
    keys = iter(jax.random.split(key, 16))

    def nrm(shape, scale=0.1):
        return scale * jax.random.normal(next(keys), shape, dtype=jnp.float32)

    node_enc_p = (nrm((3, ADIM)), nrm((1, ADIM)), nrm((ADIM, ADIM)), nrm((1, ADIM)))
    blocks = [(nrm((N_RADIAL, ADIM)), nrm((1, ADIM))) for _ in range(N_BLOCKS)]
    lin_out = (nrm((ADIM, HEADS)), nrm((1, HEADS)))
    return {"node_enc": node_enc_p, "blocks": blocks, "lin_out": lin_out}


if __name__ == "__main__":
    key = jax.random.PRNGKey(0)
    kp, k0, k1 = jax.random.split(key, 3)
    params = init_params(kp)

    B, N = 2, 16
    pos_0 = jax.random.uniform(k0, (B, N, 3), dtype=jnp.float32) * jnp.asarray(BOX)
    pos_1 = pos_0 + 0.05 * jax.random.normal(k1, (B, N, 3), dtype=jnp.float32)

    out = discriminator_forward(params, pos_0, pos_1)
    out = jax.block_until_ready(out)

    ref = ref_forward(params, pos_0, pos_1)
    assert out.shape == (B, HEADS)
    assert jnp.allclose(out, ref, atol=1e-4, rtol=1e-4), (out, ref)
    print("KERNEL_OK")
</pallas_src>

<mosaic_0001>
module attributes {stable_mosaic.version = 11 : i64} {
  func.func @_fused_kernel(%arg0: i32, %arg1: memref<32x8xf32, #tpu.memory_space<vmem>>, %arg2: memref<4x32x16xf32, #tpu.memory_space<vmem>>, %arg3: memref<80x32xf32, #tpu.memory_space<vmem>>, %arg4: memref<1x128xf32, #tpu.memory_space<vmem>>, %arg5: memref<2x2xf32, #tpu.memory_space<vmem>>) attributes {dimension_semantics = [#tpu.dimension_semantics<arbitrary>], iteration_bounds = array<i64: 1>, scalar_prefetch = 0 : i64, scratch_operands = 0 : i64, tpu.core_type = #tpu.core_type<tc>, window_params = [{pipeline_mode = #tpu.pipeline_mode<synchronous>, transform_indices = @transform_0, window_bounds = array<i64: 32, 8>}, {pipeline_mode = #tpu.pipeline_mode<synchronous>, transform_indices = @transform_1, window_bounds = array<i64: 4, 32, 16>}, {pipeline_mode = #tpu.pipeline_mode<synchronous>, transform_indices = @transform_2, window_bounds = array<i64: 80, 32>}, {pipeline_mode = #tpu.pipeline_mode<synchronous>, transform_indices = @transform_3, window_bounds = array<i64: 1, 128>}, {pipeline_mode = #tpu.pipeline_mode<synchronous>, transform_indices = @transform_4, window_bounds = array<i64: 2, 2>}]} {
    %c0 = arith.constant 0 : index
    %c0_0 = arith.constant 0 : index
    %0 = vector.load %arg3[%c0, %c0_0] : memref<80x32xf32, #tpu.memory_space<vmem>>, vector<80x32xf32>
    %1 = vector.extract_strided_slice %0 {offsets = [0, 0], sizes = [8, 32], strides = [1, 1]} : vector<80x32xf32> to vector<8x32xf32>
    %2 = vector.extract_strided_slice %0 {offsets = [8, 0], sizes = [32, 32], strides = [1, 1]} : vector<80x32xf32> to vector<32x32xf32>
    %3 = vector.extract_strided_slice %0 {offsets = [40, 0], sizes = [8, 32], strides = [1, 1]} : vector<80x32xf32> to vector<8x32xf32>
    %4 = vector.extract_strided_slice %0 {offsets = [48, 0], sizes = [32, 2], strides = [1, 1]} : vector<80x32xf32> to vector<32x2xf32>
    %c0_1 = arith.constant 0 : index
    %c0_2 = arith.constant 0 : index
    %5 = vector.load %arg4[%c0_1, %c0_2] : memref<1x128xf32, #tpu.memory_space<vmem>>, vector<1x128xf32>
    %6 = vector.extract_strided_slice %5 {offsets = [0, 0], sizes = [1, 32], strides = [1, 1]} : vector<1x128xf32> to vector<1x32xf32>
    %7 = vector.extract_strided_slice %5 {offsets = [0, 32], sizes = [1, 32], strides = [1, 1]} : vector<1x128xf32> to vector<1x32xf32>
    %8 = vector.extract_strided_slice %5 {offsets = [0, 64], sizes = [1, 32], strides = [1, 1]} : vector<1x128xf32> to vector<1x32xf32>
    %9 = vector.extract_strided_slice %5 {offsets = [0, 96], sizes = [1, 2], strides = [1, 1]} : vector<1x128xf32> to vector<1x2xf32>
    %c0_3 = arith.constant 0 : index
    %c0_4 = arith.constant 0 : index
    %10 = vector.load %arg1[%c0_3, %c0_4] : memref<32x8xf32, #tpu.memory_space<vmem>>, vector<32x8xf32>
    %cst = arith.constant dense<0.000000e+00> : vector<32x32xf32>
    %11 = tpu.matmul %10, %1, %cst {dimension_numbers = #tpu.dot_dimension_numbers<[1], [0], [0], [1], [0, 0, 1, 1], [], []>} : vector<32x8xf32>, vector<8x32xf32>, vector<32x32xf32> -> vector<32x32xf32>
    %12 = vector.broadcast %6 : vector<1x32xf32> to vector<32x32xf32>
    %13 = arith.addf %11, %12 : vector<32x32xf32>
    %cst_5 = arith.constant 0.000000e+00 : f32
    %14 = vector.broadcast %cst_5 : f32 to vector<32x32xf32>
    %15 = arith.cmpf ogt, %13, %14 : vector<32x32xf32>
    %cst_6 = arith.constant 2.000000e-01 : f32
    %16 = vector.broadcast %cst_6 : f32 to vector<32x32xf32>
    %17 = arith.mulf %16, %13 : vector<32x32xf32>
    %18 = arith.select %15, %13, %17 : vector<32x32xi1>, vector<32x32xf32>
    %cst_7 = arith.constant dense<0.000000e+00> : vector<32x32xf32>
    %19 = tpu.matmul %18, %2, %cst_7 {dimension_numbers = #tpu.dot_dimension_numbers<[1], [0], [0], [1], [0, 0, 1, 1], [], []>} : vector<32x32xf32>, vector<32x32xf32>, vector<32x32xf32> -> vector<32x32xf32>
    %20 = vector.broadcast %7 : vector<1x32xf32> to vector<32x32xf32>
    %21 = arith.addf %19, %20 : vector<32x32xf32>
    %c0_8 = arith.constant 0 : index
    %c0_9 = arith.constant 0 : index
    %c0_10 = arith.constant 0 : index
    %22 = vector.load %arg2[%c0_8, %c0_9, %c0_10] : memref<4x32x16xf32, #tpu.memory_space<vmem>>, vector<4x32x16xf32>
    %23 = vector.extract_strided_slice %22 {offsets = [0, 0, 0], sizes = [3, 32, 16], strides = [1, 1, 1]} : vector<4x32x16xf32> to vector<3x32x16xf32>
    %24 = math.sin %23 : vector<3x32x16xf32>
    %25 = arith.mulf %24, %24 : vector<3x32x16xf32>
    %26 = vector.extract_strided_slice %25 {offsets = [0, 0, 0], sizes = [1, 32, 16], strides = [1, 1, 1]} : vector<3x32x16xf32> to vector<1x32x16xf32>
    %27 = vector.shape_cast %26 : vector<1x32x16xf32> to vector<32x16xf32>
    %cst_11 = arith.constant 0.281447738 : f32
    %28 = vector.broadcast %cst_11 : f32 to vector<32x16xf32>
    %29 = arith.mulf %28, %27 : vector<32x16xf32>
    %30 = vector.extract_strided_slice %25 {offsets = [1, 0, 0], sizes = [1, 32, 16], strides = [1, 1, 1]} : vector<3x32x16xf32> to vector<1x32x16xf32>
    %31 = vector.shape_cast %30 : vector<1x32x16xf32> to vector<32x16xf32>
    %cst_12 = arith.constant 0.281447738 : f32
    %32 = vector.broadcast %cst_12 : f32 to vector<32x16xf32>
    %33 = arith.mulf %32, %31 : vector<32x16xf32>
    %34 = arith.addf %29, %33 : vector<32x16xf32>
    %35 = vector.extract_strided_slice %25 {offsets = [2, 0, 0], sizes = [1, 32, 16], strides = [1, 1, 1]} : vector<3x32x16xf32> to vector<1x32x16xf32>
    %36 = vector.shape_cast %35 : vector<1x32x16xf32> to vector<32x16xf32>
    %cst_13 = arith.constant 0.281447738 : f32
    %37 = vector.broadcast %cst_13 : f32 to vector<32x16xf32>
    %38 = arith.mulf %37, %36 : vector<32x16xf32>
    %39 = arith.addf %34, %38 : vector<32x16xf32>
    %40 = vector.extract_strided_slice %22 {offsets = [3, 0, 0], sizes = [1, 32, 16], strides = [1, 1, 1]} : vector<4x32x16xf32> to vector<1x32x16xf32>
    %41 = vector.shape_cast %40 : vector<1x32x16xf32> to vector<32x16xf32>
    %cst_14 = arith.constant -8.000000e+00 : f32
    %42 = vector.broadcast %cst_14 : f32 to vector<32x16xf32>
    %43 = arith.mulf %42, %39 : vector<32x16xf32>
    %44 = arith.mulf %43, %39 : vector<32x16xf32>
    %45 = math.exp %44 : vector<32x16xf32>
    %46 = arith.mulf %45, %41 : vector<32x16xf32>
    %cst_15 = arith.constant 2.000000e+00 : f32
    %47 = vector.broadcast %cst_15 : f32 to vector<32x16xf32>
    %48 = arith.mulf %47, %39 : vector<32x16xf32>
    %49 = math.exp %48 : vector<32x16xf32>
    %cst_16 = arith.constant dense<0.000000e+00> : vector<32xf32>
    %50 = vector.multi_reduction <add>, %46, %cst_16 [1] : vector<32x16xf32> to vector<32xf32>
    %51 = vector.shape_cast %50 : vector<32xf32> to vector<32x1xf32>
    %cst_17 = arith.constant 1.000000e+00 : f32
    %52 = vector.broadcast %cst_17 : f32 to vector<32x1xf32>
    %53 = arith.mulf %51, %52 : vector<32x1xf32>
    %54 = arith.mulf %46, %49 : vector<32x16xf32>
    %cst_18 = arith.constant dense<0.000000e+00> : vector<32xf32>
    %55 = vector.multi_reduction <add>, %54, %cst_18 [1] : vector<32x16xf32> to vector<32xf32>
    %56 = vector.shape_cast %55 : vector<32xf32> to vector<32x1xf32>
    %cst_19 = arith.constant 0.882496893 : f32
    %57 = vector.broadcast %cst_19 : f32 to vector<32x1xf32>
    %58 = arith.mulf %56, %57 : vector<32x1xf32>
    %59 = arith.mulf %54, %49 : vector<32x16xf32>
    %cst_20 = arith.constant dense<0.000000e+00> : vector<32xf32>
    %60 = vector.multi_reduction <add>, %59, %cst_20 [1] : vector<32x16xf32> to vector<32xf32>
    %61 = vector.shape_cast %60 : vector<32xf32> to vector<32x1xf32>
    %cst_21 = arith.constant 0.606530666 : f32
    %62 = vector.broadcast %cst_21 : f32 to vector<32x1xf32>
    %63 = arith.mulf %61, %62 : vector<32x1xf32>
    %64 = arith.mulf %59, %49 : vector<32x16xf32>
    %cst_22 = arith.constant dense<0.000000e+00> : vector<32xf32>
    %65 = vector.multi_reduction <add>, %64, %cst_22 [1] : vector<32x16xf32> to vector<32xf32>
    %66 = vector.shape_cast %65 : vector<32xf32> to vector<32x1xf32>
    %cst_23 = arith.constant 0.324652463 : f32
    %67 = vector.broadcast %cst_23 : f32 to vector<32x1xf32>
    %68 = arith.mulf %66, %67 : vector<32x1xf32>
    %69 = arith.mulf %64, %49 : vector<32x16xf32>
    %cst_24 = arith.constant dense<0.000000e+00> : vector<32xf32>
    %70 = vector.multi_reduction <add>, %69, %cst_24 [1] : vector<32x16xf32> to vector<32xf32>
    %71 = vector.shape_cast %70 : vector<32xf32> to vector<32x1xf32>
    %cst_25 = arith.constant 0.135335281 : f32
    %72 = vector.broadcast %cst_25 : f32 to vector<32x1xf32>
    %73 = arith.mulf %71, %72 : vector<32x1xf32>
    %74 = arith.mulf %69, %49 : vector<32x16xf32>
    %cst_26 = arith.constant dense<0.000000e+00> : vector<32xf32>
    %75 = vector.multi_reduction <add>, %74, %cst_26 [1] : vector<32x16xf32> to vector<32xf32>
    %76 = vector.shape_cast %75 : vector<32xf32> to vector<32x1xf32>
    %cst_27 = arith.constant 0.0439369343 : f32
    %77 = vector.broadcast %cst_27 : f32 to vector<32x1xf32>
    %78 = arith.mulf %76, %77 : vector<32x1xf32>
    %79 = arith.mulf %74, %49 : vector<32x16xf32>
    %cst_28 = arith.constant dense<0.000000e+00> : vector<32xf32>
    %80 = vector.multi_reduction <add>, %79, %cst_28 [1] : vector<32x16xf32> to vector<32xf32>
    %81 = vector.shape_cast %80 : vector<32xf32> to vector<32x1xf32>
    %cst_29 = arith.constant 0.0111089963 : f32
    %82 = vector.broadcast %cst_29 : f32 to vector<32x1xf32>
    %83 = arith.mulf %81, %82 : vector<32x1xf32>
    %84 = arith.mulf %79, %49 : vector<32x16xf32>
    %cst_30 = arith.constant dense<0.000000e+00> : vector<32xf32>
    %85 = vector.multi_reduction <add>, %84, %cst_30 [1] : vector<32x16xf32> to vector<32xf32>
    %86 = vector.shape_cast %85 : vector<32xf32> to vector<32x1xf32>
    %cst_31 = arith.constant 0.00218749116 : f32
    %87 = vector.broadcast %cst_31 : f32 to vector<32x1xf32>
    %88 = arith.mulf %86, %87 : vector<32x1xf32>
    %89 = tpu.concatenate %53, %58, %63, %68, %73, %78, %83, %88 in 1 : vector<32x1xf32>, vector<32x1xf32>, vector<32x1xf32>, vector<32x1xf32>, vector<32x1xf32>, vector<32x1xf32>, vector<32x1xf32>, vector<32x1xf32> -> vector<32x8xf32>
    %cst_32 = arith.constant 1.600000e+01 : f32
    %90 = vector.broadcast %cst_32 : f32 to vector<32x32xf32>
    %91 = arith.mulf %90, %21 : vector<32x32xf32>
    %cst_33 = arith.constant dense<0.000000e+00> : vector<32x32xf32>
    %92 = tpu.matmul %89, %3, %cst_33 {dimension_numbers = #tpu.dot_dimension_numbers<[1], [0], [0], [1], [0, 0, 1, 1], [], []>} : vector<32x8xf32>, vector<8x32xf32>, vector<32x32xf32> -> vector<32x32xf32>
    %93 = arith.addf %91, %92 : vector<32x32xf32>
    %94 = vector.broadcast %8 : vector<1x32xf32> to vector<32x32xf32>
    %95 = arith.addf %93, %94 : vector<32x32xf32>
    %96 = vector.extract_strided_slice %95 {offsets = [0, 0], sizes = [16, 32], strides = [1, 1]} : vector<32x32xf32> to vector<16x32xf32>
    %cst_34 = arith.constant dense<0.000000e+00> : vector<32xf32>
    %97 = vector.multi_reduction <add>, %96, %cst_34 [0] : vector<16x32xf32> to vector<32xf32>
    %98 = vector.shape_cast %97 : vector<32xf32> to vector<1x32xf32>
    %99 = vector.extract_strided_slice %95 {offsets = [16, 0], sizes = [16, 32], strides = [1, 1]} : vector<32x32xf32> to vector<16x32xf32>
    %cst_35 = arith.constant dense<0.000000e+00> : vector<32xf32>
    %100 = vector.multi_reduction <add>, %99, %cst_35 [0] : vector<16x32xf32> to vector<32xf32>
    %101 = vector.shape_cast %100 : vector<32xf32> to vector<1x32xf32>
    %102 = tpu.concatenate %98, %101 in 0 : vector<1x32xf32>, vector<1x32xf32> -> vector<2x32xf32>
    %cst_36 = arith.constant 6.250000e-02 : f32
    %103 = vector.broadcast %cst_36 : f32 to vector<2x32xf32>
    %104 = arith.mulf %102, %103 : vector<2x32xf32>
    %cst_37 = arith.constant dense<0.000000e+00> : vector<2x2xf32>
    %105 = tpu.matmul %104, %4, %cst_37 {dimension_numbers = #tpu.dot_dimension_numbers<[1], [0], [0], [1], [0, 0, 1, 1], [], []>} : vector<2x32xf32>, vector<32x2xf32>, vector<2x2xf32> -> vector<2x2xf32>
    %106 = vector.broadcast %9 : vector<1x2xf32> to vector<2x2xf32>
    %107 = arith.addf %105, %106 : vector<2x2xf32>
    %c0_38 = arith.constant 0 : index
    %c0_39 = arith.constant 0 : index
    %108 = vector.load %arg5[%c0_38, %c0_39] : memref<2x2xf32, #tpu.memory_space<vmem>>, vector<2x2xf32>
    tpu.vector_store %arg5[%c0_38, %c0_39], %107 {strides = array<i32>} : memref<2x2xf32, #tpu.memory_space<vmem>>, vector<2x2xf32>,
    return
  }
  func.func @transform_0(%arg0: i32) -> (i32, i32) {
    %c0_i32 = arith.constant 0 : i32
    %c0_i32_0 = arith.constant 0 : i32
    %c0_i32_1 = arith.constant 0 : i32
    return %c0_i32, %c0_i32_0 : i32, i32
  }
  func.func @transform_1(%arg0: i32) -> (i32, i32, i32) {
    %c0_i32 = arith.constant 0 : i32
    %c0_i32_0 = arith.constant 0 : i32
    %c0_i32_1 = arith.constant 0 : i32
    %c0_i32_2 = arith.constant 0 : i32
    return %c0_i32, %c0_i32_0, %c0_i32_1 : i32, i32, i32
  }
  func.func @transform_2(%arg0: i32) -> (i32, i32) {
    %c0_i32 = arith.constant 0 : i32
    %c0_i32_0 = arith.constant 0 : i32
    %c0_i32_1 = arith.constant 0 : i32
    return %c0_i32, %c0_i32_0 : i32, i32
  }
  func.func @transform_3(%arg0: i32) -> (i32, i32) {
    %c0_i32 = arith.constant 0 : i32
    %c0_i32_0 = arith.constant 0 : i32
    %c0_i32_1 = arith.constant 0 : i32
    return %c0_i32, %c0_i32_0 : i32, i32
  }
  func.func @transform_4(%arg0: i32) -> (i32, i32) {
    %c0_i32 = arith.constant 0 : i32
    %c0_i32_0 = arith.constant 0 : i32
    %c0_i32_1 = arith.constant 0 : i32
    return %c0_i32, %c0_i32_0 : i32, i32
  }
}

</mosaic_0001>

<bundles_post_ra>
// kernel: sub.25
= control target key start
LH: loop header
LB: loop body
LE: loop exit
PB: predicated region body
PF: predicated region fallthrough
CT: control target
= control target key end

     0   :  { %s78_s0 = inlined_call_operand.vmem [shape: f32[2,16,3], index: 0, kind: input, shape index: {}]   ;;  %s79_s1 = inlined_call_operand.vmem [shape: f32[2,16,3], index: 1, kind: input, shape index: {}]   ;;  %s80_s2 = inlined_call_operand.vmem [shape: f32[2,16,3], index: 2, kind: output, shape index: {}]  }
   0x1   :  { %v3_v0 = vld [vmem:[%s78_s0] sm:$0x3]  ;;  %v30_v2 = vld [vmem:[%s78_s0 + $0x2] sm:$0x3]  ;;  %v33_v5 = vld [vmem:[%s78_s0 + $0x4] sm:$0x3] }
   0x2   :  { %v4_v1 = vld [vmem:[%s79_s1] sm:$0x3]  ;;  %v31_v4 = vld [vmem:[%s79_s1 + $0x2] sm:$0x3]  ;;  %v34_v6 = vld [vmem:[%s79_s1 + $0x4] sm:$0x3] }
   0x3   :  { %v7_v3 = vsub.f32 %v3_v0, %v4_v1  ;;  %v16_v7 = vsub.f32 %v30_v2, %v31_v4  ;;  %v26_v8 = vsub.f32 %v33_v5, %v34_v6 }
   0x5   :  { %9 = vst [vmem:[%s80_s2] sm:$0x3] %v7_v3  ;;  %32 = vst [vmem:[%s80_s2 + $0x2] sm:$0x3] %v16_v7 }
   0x6   :  { %35 = vst [vmem:[%s80_s2 + $0x4] sm:$0x3] %v26_v8 }

// kernel: discriminator_forward.1
= control target key start
LH: loop header
LB: loop body
LE: loop exit
PB: predicated region body
PF: predicated region fallthrough
CT: control target
= control target key end

     0   :  { %vm39_vm0 = vcmask 64512   ;;  %s3581_s0 = inlined_call_operand.vmem [shape: f32[32,8], index: 0, kind: input, shape index: {}]   ;;  %s3582_s1 = inlined_call_operand.vmem [shape: f32[4,32,16], index: 1, kind: input, shape index: {}]   ;;  %s3583_s2 = inlined_call_operand.vmem [shape: f32[80,32], index: 2, kind: input, shape index: {}]   ;;  %s3584_s3 = inlined_call_operand.vmem [shape: f32[1,128], index: 3, kind: input, shape index: {}]   ;;  %s3585_s4 = inlined_call_operand.hbm [shape: f32[2,2], index: 4, kind: output, shape index: {}]  }
   0x1   :  { %v18_v0 = vld [vmem:[%s3583_s2] sm:$0xff]  ;;  %v30_v2 = vld [vmem:[%s3581_s0 + $0x8] sm:$0xff]  ;;  %v31_v3 = vld [vmem:[%s3581_s0 + $0x10] sm:$0xff] }
   0x2   :  { %v29_v1 = vld [vmem:[%s3581_s0] sm:$0xff]  ;;  %2076 = vmatprep.subr.mxu0 %v18_v0  ;;  %v2335_v4 = vld [vmem:[%s3582_s1 + $0x8] sm:$0xff]  ;;  %v32_v7 = vld [vmem:[%s3581_s0 + $0x18] sm:$0xff] }
   0x3   :  { %2078 = vmatprep.mubr.msk.f32.mxu0 %vm39_vm0, %v29_v1  ;;  %2077 = vmatpush3.msra.mxu0 %v18_v0  ;;  %v2340_v5 = vld [vmem:[%s3582_s1 + $0x28] sm:$0xff]  ;;  %v370_v8 = vand.u32 2147483647, %v2335_v4  ;;  %v373_v9 = vand.u32 2139095040, %v2335_v4 }
   0x4   :  { %v2345_v6 = vld [vmem:[%s3582_s1 + $0x48] sm:$0xff]  ;;  %2079 = vmatmul.mubr.msk.f32.vlgmr.msra.gmra.mrb[0].mxu0 %vm39_vm0, %v30_v2  ;;  %v786_v10 = vand.u32 2147483647, %v2340_v5  ;;  %v789_v11 = vand.u32 2139095040, %v2340_v5 }
   0x5   :  { %2081 = vmatprep.mubr.msk.f32.mxu0 %vm39_vm0, %v31_v3  ;;  %v1205_v12 = vand.u32 2139095040, %v2345_v6  ;;  %v374_v13 = vshrl.u32 %v373_v9, 23  ;;  %v377_v14 = vand.u32 8388607, %v370_v8  ;;  %v1202_v27 = vand.u32 2147483647, %v2345_v6 }
   0x6   :  { %v790_v15 = vshrl.u32 %v789_v11, 23  ;;  %v793_v16 = vand.u32 8388607, %v786_v10 }
   0x7   :  { %v1206_v17 = vshrl.u32 %v1205_v12, 23  ;;  %v2004_v18 = vadd.s32 4294967169, %v374_v13  ;;  %v378_v22 = vor.u32 8388608, %v377_v14 }
   0x8   :  { %2082 = vmatmul.mubr.msk.f32.gmra.mrb[2].mxu0 %vm39_vm0, %v32_v7  ;;  %v2020_v19 = vadd.s32 4294967169, %v790_v15  ;;  %v794_v23 = vor.u32 8388608, %v793_v16 }
   0x9   :  { %v2036_v20 = vadd.s32 4294967169, %v1206_v17  ;;  %v380_v21 = vadd.s32 1, %v2004_v18 }
   0xa   :  { %v796_v24 = vadd.s32 1, %v2020_v19 }
   0xb   :  { %v1212_v25 = vadd.s32 1, %v2036_v20  ;;  %vm381_vm1 = vcmp.gt.s32.totalorder %v380_v21, 0 }
   0xc   :  { %v382_v26 = vsel %vm381_vm1, %v380_v21, 0  ;;  %vm797_vm2 = vcmp.gt.s32.totalorder %v796_v24, 0 }
   0xd   :  { %vm1213_vm3 = vcmp.gt.s32.totalorder %v1212_v25, 0  ;;  %v383_v28 = vshrl.u32 %v382_v26, 5  ;;  %v384_v29 = vand.u32 31, %v382_v26  ;;  %v798_v30 = vsel %vm797_vm2, %v796_v24, 0 }
   0xe   :  { %v2363_v31 = vsel %vm1213_vm3, %v1212_v25, 0 }
   0xf   :  { %9 = vsyncpa [#allocation3], 0  ;;  %v2365_v32 = vshll.u32 %v378_v22, 8  ;;  %v2367_v33 = vshrl.u32 %v798_v30, 5  ;;  %v800_v34 = vand.u32 31, %v798_v30  ;;  %v2369_v35 = vshll.u32 %v794_v23, 8 }
  0x10   :  { %v385_v36 = vsub.s32 32, %v384_v29  ;;  %v2281_v37 = vmov 683565275   ;;  %v2282_v39 = vmov 2475754826   ;;  %vm402_vm4 = vcmp.lt.s32.totalorder %v383_v28, 1 }
  0x11   :  { %v387_v38 = vshll.u32 %v2281_v37, %v384_v29  ;;  %v390_v40 = vshll.u32 %v2282_v39, %v384_v29  ;;  %v2283_v41 = vmov 2131351028   ;;  %v2284_v43 = vmov 2102212464   ;;  %s2287_s15 = smov 96   ;;  %s2288_s16 = smov 64  }
  0x12   :  { %v393_v42 = vshll.u32 %v2283_v41, %v384_v29  ;;  %v396_v44 = vshll.u32 %v2284_v43, %v384_v29  ;;  %v2285_v45 = vmov 920167782   ;;  %v2377_v47 = vand.u32 31, %v2363_v31  ;;  %s2292_s25 = smov 32  }
  0x13   :  { %v399_v46 = vshll.u32 %v2285_v45, %v384_v29  ;;  %v386_v48 = vshrl.u32 %v2281_v37, %v385_v36  ;;  %v388_v49 = vshrl.u32 %v2282_v39, %v385_v36  ;;  %v391_v50 = vshrl.u32 %v2283_v41, %v385_v36 }
  0x14   :  { %v394_v51 = vshrl.u32 %v2284_v43, %v385_v36  ;;  %v397_v52 = vshrl.u32 %v2285_v45, %v385_v36  ;;  %v2286_v53 = vmov 1326507024   ;;  %vm403_vm5 = vcmp.lt.s32.totalorder %v383_v28, 2 }
  0x15   :  { %v400_v54 = vshrl.u32 %v2286_v53, %v385_v36  ;;  %vm405_vm6 = vcmp.lt.s32.totalorder %v383_v28, 4  ;;  %v389_v55 = vor.u32 %v388_v49, %v387_v38  ;;  %v392_v56 = vor.u32 %v391_v50, %v390_v40 }
  0x16   :  { %v395_v57 = vor.u32 %v394_v51, %v393_v42  ;;  %v801_v58 = vsub.s32 32, %v800_v34  ;;  %v398_v59 = vor.u32 %v397_v52, %v396_v44  ;;  %vm404_vm7 = vcmp.lt.s32.totalorder %v383_v28, 3 }
  0x17   :  { %v401_v60 = vor.u32 %v400_v54, %v399_v46  ;;  %v803_v61 = vshll.u32 %v2281_v37, %v800_v34  ;;  %v406_v62 = vsel %vm402_vm4, %v386_v48, %v389_v55  ;;  %v410_v0 = vsel %vm402_vm4, %v389_v55, %v392_v56 }
  0x18   :  { %v407_v63 = vsel %vm405_vm6, %v395_v57, 2102212464  ;;  %v414_v1 = vsel %vm402_vm4, %v392_v56, %v395_v57  ;;  %v411_v3 = vsel %vm405_vm6, %v398_v59, 920167782  ;;  %v806_v9 = vshll.u32 %v2282_v39, %v800_v34 }
  0x19   :  { %v408_v2 = vsel %vm404_vm7, %v392_v56, %v407_v63  ;;  %v415_v7 = vsel %vm405_vm6, %v401_v60, 1326507024  ;;  %v412_v11 = vsel %vm404_vm7, %v395_v57, %v411_v3  ;;  %v802_v13 = vshrl.u32 %v2281_v37, %v801_v58 }
  0x1a   :  { %v416_v12 = vsel %vm404_vm7, %v398_v59, %v415_v7  ;;  %v804_v14 = vshrl.u32 %v2282_v39, %v801_v58  ;;  %v409_v15 = vsel %vm403_vm5, %v406_v62, %v408_v2  ;;  %v413_v16 = vsel %vm403_vm5, %v410_v0, %v412_v11 }
  0x1b   :  { %v417_v17 = vsel %vm403_vm5, %v414_v1, %v416_v12  ;;  %v807_v18 = vshrl.u32 %v2283_v41, %v801_v58  ;;  %v2401_v21 = vmul.u32.u64.low %v2365_v32, %v413_v16  ;;  %v2402_v22 = vmul.u32.u64.high %v2365_v32, %v413_v16, %v2401_v21 }
  0x1c   :  { %v2397_v19 = vmul.u32.u64.low %v2365_v32, %v417_v17  ;;  %v2398_v20 = vmul.u32.u64.high %v2365_v32, %v417_v17, %v2397_v19  ;;  %v805_v23 = vor.u32 %v804_v14, %v803_v61  ;;  %v809_v25 = vshll.u32 %v2283_v41, %v800_v34 }
  0x1d   :  { %v808_v24 = vor.u32 %v807_v18, %v806_v9  ;;  %v810_v26 = vshrl.u32 %v2284_v43, %v801_v58  ;;  %v812_v28 = vshll.u32 %v2284_v43, %v800_v34  ;;  %v813_v29 = vshrl.u32 %v2285_v45, %v801_v58 }
  0x1e   :  { %v815_v30 = vshll.u32 %v2285_v45, %v800_v34  ;;  %v816_v36 = vshrl.u32 %v2286_v53, %v801_v58  ;;  %v425_v38 = vmul.u32 %v2365_v32, %v409_v15  ;;  %vm818_vm8 = vcmp.lt.s32.totalorder %v2367_v33, 1 }
  0x1f   :  { %v811_v40 = vor.u32 %v810_v26, %v809_v25  ;;  %vm819_vm9 = vcmp.lt.s32.totalorder %v2367_v33, 2  ;;  %vm427_vm10 = vc.u32 %v2398_v20, %v2401_v21  ;;  %v428_v42 = vadd.s32 1, %v2402_v22 }
  0x20   :  { %v814_v44 = vor.u32 %v813_v29, %v812_v28  ;;  %vm820_vm11 = vcmp.lt.s32.totalorder %v2367_v33, 3  ;;  %v817_v46 = vor.u32 %v816_v36, %v815_v30  ;;  %vm821_vm12 = vcmp.lt.s32.totalorder %v2367_v33, 4 }
  0x21   :  { %v822_v34 = vsel %vm818_vm8, %v802_v13, %v805_v23  ;;  %v826_v48 = vsel %vm818_vm8, %v805_v23, %v808_v24  ;;  %v429_v32 = vsel %vm427_vm10, %v428_v42, %v2402_v22  ;;  %v823_v49 = vsel %vm821_vm12, %v811_v40, 2102212464 }
  0x22   :  { %v827_v50 = vsel %vm821_vm12, %v814_v44, 920167782  ;;  %v830_v51 = vsel %vm818_vm8, %v808_v24, %v811_v40  ;;  %v430_v52 = vadd.s32 %v429_v32, %v425_v38  ;;  %v824_v54 = vsel %vm820_vm11, %v808_v24, %v823_v49 }
  0x23   :  { %v828_v55 = vsel %vm820_vm11, %v811_v40, %v827_v50  ;;  %v831_v56 = vsel %vm821_vm12, %v817_v46, 1326507024  ;;  %v825_v57 = vsel %vm819_vm9, %v822_v34, %v824_v54  ;;  %v1217_v60 = vsub.s32 32, %v2377_v47 }
  0x24   :  { %v829_v58 = vsel %vm819_vm9, %v826_v48, %v828_v55  ;;  %v832_v59 = vsel %vm820_vm11, %v814_v44, %v831_v56  ;;  %v431_v61 = vadd.s32 536870912, %v430_v52  ;;  %v841_v7 = vmul.u32 %v2369_v35, %v825_v57 }
  0x25   :  { %v833_v62 = vsel %vm819_vm9, %v830_v51, %v832_v59  ;;  %v2428_v63 = vmul.u32.u64.low %v2369_v35, %v829_v58  ;;  %v2429_v0 = vmul.u32.u64.high %v2369_v35, %v829_v58, %v2428_v63  ;;  %v1209_v9 = vand.u32 8388607, %v1202_v27 }
  0x26   :  { %v2433_v1 = vmul.u32.u64.low %v2369_v35, %v833_v62  ;;  %v2434_v2 = vmul.u32.u64.high %v2369_v35, %v833_v62, %v2433_v1  ;;  %v432_v3 = vshrl.u32 %v431_v61, 30  ;;  %v1219_v11 = vshll.u32 %v2281_v37, %v2377_v47 }
  0x27   :  { %v1220_v33 = vshrl.u32 %v2282_v39, %v1217_v60  ;;  %v844_v13 = vadd.s32 1, %v2429_v0  ;;  %v1222_v14 = vshll.u32 %v2282_v39, %v2377_v47  ;;  %v1228_v15 = vshll.u32 %v2284_v43, %v2377_v47 }
  0x28   :  { %v433_v12 = vshll.u32 %v432_v3, 30  ;;  %vm843_vm13 = vc.u32 %v2434_v2, %v2428_v63  ;;  %v1223_v35 = vshrl.u32 %v2283_v41, %v1217_v60  ;;  %v1225_v16 = vshll.u32 %v2283_v41, %v2377_v47 }
  0x29   :  { %v1226_v17 = vshrl.u32 %v2284_v43, %v1217_v60  ;;  %vm372_vm14 = vcmp.lt.s32.totalorder %v2335_v4, 0  ;;  %v845_v19 = vsel %vm843_vm13, %v844_v13, %v2429_v0  ;;  %v1215_v22 = vshrl.u32 %v2363_v31, 5  ;;  %v2467_v31 = vld [vmem:[%s3582_s1] sm:$0xff] }
  0x2a   :  { %v2454_v18 = vsub.s32 %v430_v52, %v433_v12  ;;  %v1229_v23 = vshrl.u32 %v2285_v45, %v1217_v60  ;;  %v846_v24 = vadd.s32 %v845_v19, %v841_v7  ;;  %v1210_v25 = vor.u32 8388608, %v1209_v9 }
  0x2b   :  { %v1231_v26 = vshll.u32 %v2285_v45, %v2377_v47  ;;  %v1232_v28 = vshrl.u32 %v2286_v53, %v1217_v60  ;;  %v456_v30 = vsub.s32 4, %v432_v3  ;;  %v1218_v36 = vshrl.u32 %v2281_v37, %v1217_v60 }
  0x2c   :  { %v436_v29 = vsub.s32 0, %v2454_v18  ;;  %v1230_v38 = vor.u32 %v1229_v23, %v1228_v15  ;;  %v847_v40 = vadd.s32 536870912, %v846_v24  ;;  %v1221_v42 = vor.u32 %v1220_v33, %v1219_v11 }
  0x2d   :  { %v1224_v44 = vor.u32 %v1223_v35, %v1222_v14  ;;  %v1227_v46 = vor.u32 %v1226_v17, %v1225_v16  ;;  %vm788_vm15 = vcmp.lt.s32.totalorder %v2340_v5, 0  ;;  %v1233_v47 = vor.u32 %v1232_v28, %v1231_v26 }
  0x2e   :  { %v2005_v34 = vmin.u32 %v436_v29, %v2454_v18  ;;  %vm1234_vm1 = vcmp.lt.s32.totalorder %v1215_v22, 1  ;;  %vm1237_vm2 = vcmp.lt.s32.totalorder %v1215_v22, 4  ;;  %v848_v48 = vshrl.u32 %v847_v40, 30 }
  0x2f   :  { %vm1236_vm3 = vcmp.lt.s32.totalorder %v1215_v22, 3  ;;  %v1239_v32 = vsel %vm1237_vm2, %v1227_v46, 2102212464  ;;  %v1243_v49 = vsel %vm1237_vm2, %v1230_v38, 920167782  ;;  %v426_v51 = vadd.s32 %v2401_v21, %v2398_v20 }
  0x30   :  { %vm2475_vm4 = vcmp.le.f32.partialorder %v370_v8, 0.7853982  ;;  %v438_v52 = vclz %v2005_v34  ;;  %v1250_v54 = vshll.u32 %v1210_v25, 8  ;;  %v269_v55 = vand.u32 2139095040, %v2467_v31 }
  0x31   :  { %v849_v56 = vshll.u32 %v848_v48, 30  ;;  %vm1235_vm5 = vcmp.lt.s32.totalorder %v1215_v22, 2  ;;  %v1238_v57 = vsel %vm1234_vm1, %v1218_v36, %v1221_v42  ;;  %v1240_v58 = vsel %vm1236_vm3, %v1224_v44, %v1239_v32 }
  0x32   :  { %v2006_v59 = vadd.s32 4294967294, %v438_v52  ;;  %v1242_v60 = vsel %vm1234_vm1, %v1221_v42, %v1224_v44  ;;  %v1244_v8 = vsel %vm1236_vm3, %v1227_v46, %v1243_v49  ;;  %v1246_v61 = vsel %vm1234_vm1, %v1224_v44, %v1227_v46 }
  0x33   :  { %v457_v20 = vsel %vm372_vm14, %v456_v30, %v432_v3  ;;  %v850_v21 = vsub.s32 %v846_v24, %v849_v56  ;;  %v872_v62 = vsub.s32 4, %v848_v48  ;;  %v1247_v0 = vsel %vm1237_vm2, %v1233_v47, 1326507024 }
  0x34   :  { %vm2007_vm6 = vcmp.lt.s32.totalorder %v2006_v59, 0  ;;  %v1241_v1 = vsel %vm1235_vm5, %v1238_v57, %v1240_v58  ;;  %v1248_v7 = vsel %vm1236_vm3, %v1230_v38, %v1247_v0  ;;  %v270_v9 = vshrl.u32 %v269_v55, 23 }
  0x35   :  { %v441_v11 = vsel %vm2007_vm6, 0, %v2006_v59  ;;  %v852_v33 = vsub.s32 0, %v850_v21  ;;  %v1245_v12 = vsel %vm1235_vm5, %v1242_v60, %v1244_v8  ;;  %v1249_v13 = vsel %vm1235_vm5, %v1246_v61, %v1248_v7 }
  0x36   :  { %v442_v14 = vsub.s32 32, %v441_v11  ;;  %v443_v15 = vshll.u32 %v2454_v18, %v441_v11  ;;  %v446_v3 = vsub.s32 4294967266, %v441_v11  ;;  %v2000_v35 = vadd.s32 4294967169, %v270_v9 }
  0x37   :  { %v2021_v16 = vmin.u32 %v852_v33, %v850_v21  ;;  %v873_v17 = vsel %vm788_vm15, %v872_v62, %v848_v48  ;;  %v2497_v19 = vmul.u32.u64.low %v1250_v54, %v1249_v13  ;;  %v2498_v23 = vmul.u32.u64.high %v1250_v54, %v1249_v13, %v2497_v19 }
  0x38   :  { %v444_v24 = vshrl.u32 %v426_v51, %v442_v14  ;;  %v447_v25 = vadd.s32 127, %v446_v3  ;;  %v2500_v26 = vmul.u32.u64.low %v1250_v54, %v1245_v12  ;;  %v2501_v28 = vmul.u32.u64.high %v1250_v54, %v1245_v12, %v2500_v26 }
  0x39   :  { %v459_v22 = vsel %vm2475_vm4, 0, %v457_v20  ;;  %vm2507_vm7 = vcmp.le.f32.partialorder %v786_v10, 0.7853982  ;;  %v854_v29 = vclz %v2021_v16  ;;  %v276_v40 = vadd.s32 1, %v2000_v35 }
  0x3a   :  { %v445_v30 = vor.u32 %v444_v24, %v443_v15  ;;  %v448_v36 = vshll.u32 %v447_v25, 23  ;;  %v875_v38 = vsel %vm2507_vm7, 0, %v873_v17  ;;  %v1257_v44 = vmul.u32 %v1250_v54, %v1241_v1 }
  0x3b   :  { %v2022_v42 = vadd.s32 4294967294, %v854_v29  ;;  %vm1259_vm8 = vc.u32 %v2498_v23, %v2500_v26  ;;  %v266_v46 = vand.u32 2147483647, %v2467_v31  ;;  %v842_v10 = vadd.s32 %v2428_v63, %v2434_v2 }
  0x3c   :  { %v449_v34 = vor.u32 4788187, %v448_v36  ;;  %v452_v47 = vcvt.s32.f32 %v445_v30  ;;  %v1260_v48 = vadd.s32 1, %v2501_v28  ;;  %v463_v32 = vadd.s32 3, %v459_v22 }
  0x3d   :  { %vm2023_vm9 = vcmp.lt.s32.totalorder %v2022_v42, 0  ;;  %v879_v49 = vadd.s32 3, %v875_v38  ;;  %vm277_vm10 = vcmp.gt.s32.totalorder %v276_v40, 0  ;;  %v273_v8 = vand.u32 8388607, %v266_v46  ;;  %v2552_v38 = vld [vmem:[%s3582_s1 + $0x20] sm:$0xff] }
  0x3e   :  { %v450_v51 = vand.u32 2147483647, %v449_v34  ;;  %v857_v52 = vsel %vm2023_vm9, 0, %v2022_v42  ;;  %v1261_v55 = vsel %vm1259_vm8, %v1260_v48, %v2501_v28  ;;  %v278_v54 = vsel %vm277_vm10, %v276_v40, 0 }
  0x3f   :  { %v858_v56 = vsub.s32 32, %v857_v52  ;;  %v859_v57 = vshll.u32 %v850_v21, %v857_v52  ;;  %v862_v58 = vsub.s32 4294967266, %v857_v52  ;;  %v1262_v59 = vadd.s32 %v1261_v55, %v1257_v44 }
  0x40   :  { %v453_v60 = vmul.f32 %v452_v47, %v450_v51  ;;  %v280_v63 = vand.u32 31, %v278_v54  ;;  %v2521_v0 = vand.u32 3, %v463_v32  ;;  %v2523_v11 = vand.u32 3, %v879_v49 }
  0x41   :  { %v860_v2 = vshrl.u32 %v842_v10, %v858_v56  ;;  %v863_v61 = vadd.s32 127, %v862_v58  ;;  %v1263_v20 = vadd.s32 536870912, %v1262_v59  ;;  %v2528_v12 = vadd.s32 %v2500_v26, %v2498_v23 }
  0x42   :  { %v454_v62 = vxor.u32 2147483648, %v453_v60  ;;  %v281_v1 = vsub.s32 32, %v280_v63  ;;  %v274_v13 = vor.u32 8388608, %v273_v8  ;;  %v283_v14 = vshll.u32 %v2281_v37, %v280_v63 }
  0x43   :  { %v861_v7 = vor.u32 %v860_v2, %v859_v57  ;;  %v864_v9 = vshll.u32 %v863_v61, 23  ;;  %v1264_v33 = vshrl.u32 %v1263_v20, 30  ;;  %vm1204_vm11 = vcmp.lt.s32.totalorder %v2345_v6, 0 }
  0x44   :  { %v455_v21 = vsel %vm372_vm14, %v454_v62, %v453_v60  ;;  %v284_v17 = vshrl.u32 %v2282_v39, %v281_v1  ;;  %v286_v19 = vshll.u32 %v2282_v39, %v280_v63  ;;  %v287_v23 = vshrl.u32 %v2283_v41, %v281_v1 }
  0x45   :  { %v458_v15 = vsel %vm2475_vm4, %v2335_v4, %v455_v21  ;;  %v865_v3 = vor.u32 4788187, %v864_v9  ;;  %v868_v35 = vcvt.s32.f32 %v861_v7  ;;  %v1265_v16 = vshll.u32 %v1264_v33, 30 }
  0x46   :  { %2192 = vcosq.f32 %v458_v15  ;;  %v2540_v26 = vshrl.u32 %v278_v54, 5  ;;  %vm469_vm12 = vcmp.eq.s32.totalorder %v2521_v0, 2  ;;  %v289_v50 = vshll.u32 %v2283_v41, %v280_v63 }
  0x47   :  { %2194 = vsinq.f32 %v458_v15  ;;  %v866_v24 = vand.u32 2147483647, %v865_v3  ;;  %v2538_v25 = vsub.s32 %v1262_v59, %v1265_v16  ;;  %v290_v28 = vshrl.u32 %v2284_v43, %v281_v1 }
  0x48   :  { %v292_v22 = vshll.u32 %v2284_v43, %v280_v63  ;;  %v293_v29 = vshrl.u32 %v2285_v45, %v281_v1  ;;  %vm466_vm13 = vcmp.eq.s32.totalorder %v2521_v0, 0  ;;  %v295_v40 = vshll.u32 %v2285_v45, %v280_v63 }
  0x49   :  { %v869_v30 = vmul.f32 %v868_v35, %v866_v24  ;;  %v1268_v36 = vsub.s32 0, %v2538_v25  ;;  %v2555_v42 = vshll.u32 %v274_v13, 8  ;;  %v1288_v44 = vsub.s32 4, %v1264_v33 }
  0x4a   :  { %v285_v34 = vor.u32 %v284_v17, %v283_v14  ;;  %v288_v47 = vor.u32 %v287_v23, %v286_v19  ;;  %v296_v10 = vshrl.u32 %v2286_v53, %v281_v1  ;;  %v294_v49 = vor.u32 %v293_v29, %v292_v22 }
  0x4b   :  { %v870_v48 = vxor.u32 2147483648, %v869_v30  ;;  %v2037_v32 = vmin.u32 %v1268_v36, %v2538_v25  ;;  %vm298_vm14 = vcmp.lt.s32.totalorder %v2540_v26, 1  ;;  %vm465_vm1 = vcmp.lt.s32.totalorder %v2521_v0, 2 }
  0x4c   :  { %v282_v51 = vshrl.u32 %v2281_v37, %v281_v1  ;;  %v291_v52 = vor.u32 %v290_v28, %v289_v50  ;;  %vm301_vm2 = vcmp.lt.s32.totalorder %v2540_v26, 4  ;;  %v685_v55 = vand.u32 2139095040, %v2552_v38 }
  0x4d   :  { %v871_v54 = vsel %vm788_vm15, %v870_v48, %v869_v30  ;;  %vm2568_vm3 = vcmp.le.f32.partialorder %v1202_v27, 0.7853982  ;;  %v1270_v57 = vclz %v2037_v32  ;;  %v297_v58 = vor.u32 %v296_v10, %v295_v40 }
  0x4e   :  { %vm300_vm4 = vcmp.lt.s32.totalorder %v2540_v26, 3  ;;  %v874_v59 = vsel %vm2507_vm7, %v2340_v5, %v871_v54  ;;  %v1289_v60 = vsel %vm1204_vm11, %v1288_v44, %v1264_v33  ;;  %vm299_vm5 = vcmp.lt.s32.totalorder %v2540_v26, 2 }
  0x4f   :  { %v306_v8 = vsel %vm298_vm14, %v285_v34, %v288_v47  ;;  %2196 = vcosq.f32 %v874_v59  ;;  %v2038_v27 = vadd.s32 4294967294, %v1270_v57  ;;  %v303_v63 = vsel %vm301_vm2, %v291_v52, 2102212464 }
  0x50   :  { %v307_v2 = vsel %vm301_vm2, %v294_v49, 920167782  ;;  %v2193_v61 = vpop.eup %2192  ;;  %2198 = vsinq.f32 %v874_v59  ;;  %v302_v18 = vsel %vm298_vm14, %v282_v51, %v285_v34  ;;  %v310_v62 = vsel %vm298_vm14, %v288_v47, %v291_v52 }
  0x51   :  { %v308_v20 = vsel %vm300_vm4, %v291_v52, %v307_v2  ;;  %v2195_v1 = vpop.eup %2194  ;;  %v470_v7 = vxor.u32 2147483648, %v2193_v61  ;;  %vm2039_vm15 = vcmp.lt.s32.totalorder %v2038_v27, 0  ;;  %v311_v33 = vsel %vm301_vm2, %v297_v58, 1326507024 }
  0x52   :  { %v309_v9 = vsel %vm299_vm5, %v306_v8, %v308_v20  ;;  %v467_v21 = vxor.u32 2147483648, %v2195_v1  ;;  %v1273_v13 = vsel %vm2039_vm15, 0, %v2038_v27  ;;  %v304_v14 = vsel %vm300_vm4, %v288_v47, %v303_v63 }
  0x53   :  { %v312_v15 = vsel %vm300_vm4, %v294_v49, %v311_v33  ;;  %v471_v3 = vsel %vm469_vm12, %v470_v7, %v2195_v1  ;;  %v1274_v35 = vsub.s32 32, %v1273_v13  ;;  %v1275_v16 = vshll.u32 %v2538_v25, %v1273_v13 }
  0x54   :  { %v1278_v17 = vsub.s32 4294967266, %v1273_v13  ;;  %v468_v19 = vsel %vm466_vm13, %v2193_v61, %v467_v21  ;;  %v313_v23 = vsel %vm299_vm5, %v310_v62, %v312_v15  ;;  %v305_v29 = vsel %vm299_vm5, %v302_v18, %v304_v14 }
  0x55   :  { %v2607_v24 = vmul.u32.u64.low %v2555_v42, %v309_v9  ;;  %v2608_v50 = vmul.u32.u64.high %v2555_v42, %v309_v9, %v2607_v24  ;;  %v1276_v28 = vshrl.u32 %v2528_v12, %v1274_v35  ;;  %v686_v30 = vshrl.u32 %v685_v55, 23 }
  0x56   :  { %v1279_v22 = vadd.s32 127, %v1278_v17  ;;  %vm462_vm6 = vweird.f32 %v2335_v4  ;;  %v1291_v25 = vsel %vm2568_vm3, 0, %v1289_v60  ;;  %v472_v44 = vsel %vm465_vm1, %v468_v19, %v471_v3 }
  0x57   :  { %v2618_v36 = vmul.u32.u64.low %v2555_v42, %v313_v23  ;;  %v2619_v40 = vmul.u32.u64.high %v2555_v42, %v313_v23, %v2618_v36  ;;  %v1277_v34 = vor.u32 %v1276_v28, %v1275_v16  ;;  %v2016_v12 = vadd.s32 4294967169, %v686_v30 }
  0x58   :  { %v1280_v47 = vshll.u32 %v1279_v22, 23  ;;  %vm882_vm7 = vcmp.eq.s32.totalorder %v2523_v11, 0  ;;  %v321_v26 = vmul.u32 %v2555_v42, %v305_v29  ;;  %v324_v10 = vadd.s32 1, %v2608_v50 }
  0x59   :  { %v682_v48 = vand.u32 2147483647, %v2552_v38  ;;  %v2197_v32 = vpop.eup %2196  ;;  %vm885_vm8 = vcmp.eq.s32.totalorder %v2523_v11, 2  ;;  %v1284_v51 = vcvt.s32.f32 %v1277_v34  ;;  %v692_v52 = vadd.s32 1, %v2016_v12 }
  0x5a   :  { %v1281_v49 = vor.u32 4788187, %v1280_v47  ;;  %v2199_v55 = vpop.eup %2198  ;;  %v473_v0 = vsel %vm462_vm6, nan, %v472_v44  ;;  %v886_v54 = vxor.u32 2147483648, %v2197_v32  ;;  %v1295_v57 = vadd.s32 3, %v1291_v25 }
  0x5b   :  { %vm323_vm9 = vc.u32 %v2619_v40, %v2607_v24  ;;  %v883_v42 = vxor.u32 2147483648, %v2199_v55  ;;  %vm693_vm10 = vcmp.gt.s32.totalorder %v692_v52, 0  ;;  %vm881_vm12 = vcmp.lt.s32.totalorder %v2523_v11, 2 }
  0x5c   :  { %v1282_v58 = vand.u32 2147483647, %v1281_v49  ;;  %v325_v59 = vsel %vm323_vm9, %v324_v10, %v2608_v50  ;;  %v689_v8 = vand.u32 8388607, %v682_v48  ;;  %v694_v27 = vsel %vm693_vm10, %v692_v52, 0 }
  0x5d   :  { %v326_v60 = vadd.s32 %v325_v59, %v321_v26  ;;  %v884_v4 = vsel %vm882_vm7, %v2197_v32, %v883_v42  ;;  %v887_v63 = vsel %vm885_vm8, %v886_v54, %v2199_v55  ;;  %v696_v61 = vand.u32 31, %v694_v27  ;;  %v2677_v26 = vld [vmem:[%s3582_s1 + $0x40] sm:$0xff] }
  0x5e   :  { %v1285_v2 = vmul.f32 %v1284_v51, %v1282_v58  ;;  %v1515_v18 = vmul.f32 %v473_v0, %v473_v0  ;;  %vm878_vm13 = vweird.f32 %v2340_v5  ;;  %v2641_v1 = vand.u32 3, %v1295_v57 }
  0x5f   :  { %v327_v20 = vadd.s32 536870912, %v326_v60  ;;  %v697_v7 = vsub.s32 32, %v696_v61  ;;  %v888_v9 = vsel %vm881_vm12, %v884_v4, %v887_v63  ;;  %v690_v21 = vor.u32 8388608, %v689_v8 }
  0x60   :  { %v1286_v62 = vxor.u32 2147483648, %v1285_v2  ;;  %v699_v13 = vshll.u32 %v2281_v37, %v696_v61  ;;  %v702_v15 = vshll.u32 %v2282_v39, %v696_v61  ;;  %v2654_v16 = vmul.f32 0.28144774, %v1515_v18 }
  0x61   :  { %v2643_v33 = vshrl.u32 %v327_v20, 30  ;;  %v700_v14 = vshrl.u32 %v2282_v39, %v697_v7  ;;  %v703_v3 = vshrl.u32 %v2283_v41, %v697_v7  ;;  %v695_v19 = vshrl.u32 %v694_v27, 5 }
  0x62   :  { %v1287_v11 = vsel %vm1204_vm11, %v1286_v62, %v1285_v2  ;;  %v705_v23 = vshll.u32 %v2283_v41, %v696_v61  ;;  %v706_v50 = vshrl.u32 %v2284_v43, %v697_v7  ;;  %v889_v28 = vsel %vm878_vm13, nan, %v888_v9 }
  0x63   :  { %v1290_v35 = vsel %vm2568_vm3, %v2345_v6, %v1287_v11  ;;  %v329_v17 = vshll.u32 %v2643_v33, 30  ;;  %v2663_v29 = vshll.u32 %v690_v21, 8  ;;  %vm1301_vm11 = vcmp.eq.s32.totalorder %v2641_v1, 2 }
  0x64   :  { %2200 = vcosq.f32 %v1290_v35  ;;  %v701_v56 = vor.u32 %v700_v14, %v699_v13  ;;  %v704_v30 = vor.u32 %v703_v3, %v702_v15  ;;  %v708_v25 = vshll.u32 %v2284_v43, %v696_v61 }
  0x65   :  { %2202 = vsinq.f32 %v1290_v35  ;;  %v2661_v22 = vsub.s32 %v326_v60, %v329_v17  ;;  %v709_v36 = vshrl.u32 %v2285_v45, %v697_v7  ;;  %vm1298_vm14 = vcmp.eq.s32.totalorder %v2641_v1, 0 }
  0x66   :  { %v698_v5 = vshrl.u32 %v2281_v37, %v697_v7  ;;  %v711_v34 = vshll.u32 %v2285_v45, %v696_v61  ;;  %v712_v47 = vshrl.u32 %v2286_v53, %v697_v7  ;;  %vm1297_vm1 = vcmp.lt.s32.totalorder %v2641_v1, 2 }
  0x67   :  { %v332_v44 = vsub.s32 0, %v2661_v22  ;;  %v1519_v12 = vmul.f32 %v889_v28, %v889_v28  ;;  %v707_v10 = vor.u32 %v706_v50, %v705_v23  ;;  %v710_v32 = vor.u32 %v709_v36, %v708_v25 }
  0x68   :  { %vm714_vm2 = vcmp.lt.s32.totalorder %v695_v19, 1  ;;  %vm1294_vm3 = vweird.f32 %v2345_v6  ;;  %v713_v51 = vor.u32 %v712_v47, %v711_v34  ;;  %vm716_vm4 = vcmp.lt.s32.totalorder %v695_v19, 3 }
  0x69   :  { %v2001_v49 = vmin.u32 %v332_v44, %v2661_v22  ;;  %vm717_vm5 = vcmp.lt.s32.totalorder %v695_v19, 4  ;;  %vm715_vm15 = vcmp.lt.s32.totalorder %v695_v19, 2  ;;  %v722_v55 = vsel %vm714_vm2, %v701_v56, %v704_v30 }
  0x6a   :  { %v719_v52 = vsel %vm717_vm5, %v707_v10, 2102212464  ;;  %v723_v0 = vsel %vm717_vm5, %v710_v32, 920167782  ;;  %v322_v54 = vadd.s32 %v2607_v24, %v2619_v40  ;;  %v718_v42 = vsel %vm714_vm2, %v698_v5, %v701_v56 }
  0x6b   :  { %v334_v57 = vclz %v2001_v49  ;;  %v1101_v58 = vand.u32 2139095040, %v2677_v26  ;;  %v720_v59 = vsel %vm716_vm4, %v704_v30, %v719_v52  ;;  %v724_v60 = vsel %vm716_vm4, %v707_v10, %v723_v0 }
  0x6c   :  { %v726_v8 = vsel %vm714_vm2, %v704_v30, %v707_v10  ;;  %v727_v27 = vsel %vm717_vm5, %v713_v51, 1326507024  ;;  %v1531_v4 = vmul.f32 0.28144774, %v1519_v12  ;;  %vm268_vm6 = vcmp.lt.s32.totalorder %v2467_v31, 0 }
  0x6d   :  { %v2002_v63 = vadd.s32 4294967294, %v334_v57  ;;  %v725_v2 = vsel %vm715_vm15, %v722_v55, %v724_v60  ;;  %v728_v24 = vsel %vm716_vm4, %v710_v32, %v727_v27  ;;  %v721_v61 = vsel %vm715_vm15, %v718_v42, %v720_v59 }
  0x6e   :  { %v2201_v40 = vpop.eup %2200  ;;  %v729_v18 = vsel %vm715_vm15, %v726_v8, %v728_v24  ;;  %v2695_v20 = vmul.u32.u64.low %v2663_v29, %v725_v2  ;;  %v2696_v62 = vmul.u32.u64.high %v2663_v29, %v725_v2, %v2695_v20  ;;  %v352_v15 = vsub.s32 4, %v2643_v33 }
  0x6f   :  { %v2203_v7 = vpop.eup %2202  ;;  %v1302_v9 = vxor.u32 2147483648, %v2201_v40  ;;  %vm2003_vm7 = vcmp.lt.s32.totalorder %v2002_v63, 0  ;;  %v2700_v21 = vmul.u32.u64.low %v2663_v29, %v729_v18  ;;  %v2701_v13 = vmul.u32.u64.high %v2663_v29, %v729_v18, %v2700_v21 }
  0x70   :  { %v1299_v11 = vxor.u32 2147483648, %v2203_v7  ;;  %v337_v14 = vsel %vm2003_vm7, 0, %v2002_v63  ;;  %v1102_v3 = vshrl.u32 %v1101_v58, 23  ;;  %v737_v28 = vmul.u32 %v2663_v29, %v721_v61 }
  0x71   :  { %v1303_v35 = vsel %vm1301_vm11, %v1302_v9, %v2203_v7  ;;  %v338_v17 = vsub.s32 32, %v337_v14  ;;  %v339_v19 = vshll.u32 %v2661_v22, %v337_v14  ;;  %v342_v23 = vsub.s32 4294967266, %v337_v14 }
  0x72   :  { %v1300_v50 = vsel %vm1298_vm14, %v2201_v40, %v1299_v11  ;;  %v740_v56 = vadd.s32 1, %v2696_v62  ;;  %v2032_v30 = vadd.s32 4294967169, %v1102_v3  ;;  %v1098_v5 = vand.u32 2147483647, %v2677_v26 }
  0x73   :  { %v1304_v25 = vsel %vm1297_vm1, %v1300_v50, %v1303_v35  ;;  %v340_v36 = vshrl.u32 %v322_v54, %v338_v17  ;;  %v343_v44 = vadd.s32 127, %v342_v23  ;;  %v1535_v22 = vadd.f32 %v1531_v4, %v2654_v16 }
  0x74   :  { %v1305_v34 = vsel %vm1294_vm3, nan, %v1304_v25  ;;  %vm739_vm8 = vc.u32 %v2701_v13, %v2695_v20  ;;  %v1108_v47 = vadd.s32 1, %v2032_v30  ;;  %v353_v1 = vsel %vm268_vm6, %v352_v15, %v2643_v33 }
  0x75   :  { %v1523_v29 = vmul.f32 %v1305_v34, %v1305_v34  ;;  %v341_v12 = vor.u32 %v340_v36, %v339_v19  ;;  %v344_v10 = vshll.u32 %v343_v44, 23  ;;  %v741_v32 = vsel %vm739_vm8, %v740_v56, %v2696_v62  ;;  %v2766_v56 = vld [vmem:[%s3582_s1 + $0x10] sm:$0xff] }
  0x76   :  { %v742_v49 = vadd.s32 %v741_v32, %v737_v28  ;;  %vm1109_vm9 = vcmp.gt.s32.totalorder %v1108_v47, 0  ;;  %vm2725_vm10 = vcmp.le.f32.partialorder %v266_v46, 0.7853982  ;;  %v1105_v54 = vand.u32 8388607, %v1098_v5 }
  0x77   :  { %v1539_v51 = vmul.f32 0.28144774, %v1523_v29  ;;  %v345_v6 = vor.u32 4788187, %v344_v10  ;;  %v348_v52 = vcvt.s32.f32 %v341_v12  ;;  %v1110_v55 = vsel %vm1109_vm9, %v1108_v47, 0 }
  0x78   :  { %v743_v0 = vadd.s32 536870912, %v742_v49  ;;  %v1112_v57 = vand.u32 31, %v1110_v55  ;;  %v355_v58 = vsel %vm2725_vm10, 0, %v353_v1  ;;  %v1106_v63 = vor.u32 8388608, %v1105_v54  ;;  %v263_v54 = vld [vmem:[%s3582_s1 + $0x68] sm:$0xff] }
  0x79   :  { %v2731_v42 = vadd.f32 %v1539_v51, %v1535_v22  ;;  %v346_v33 = vand.u32 2147483647, %v345_v6  ;;  %v2738_v27 = vadd.s32 3, %v355_v58  ;;  %v1111_v40 = vshrl.u32 %v1110_v55, 5 }
  0x7a   :  { %v2735_v59 = vshrl.u32 %v743_v0, 30  ;;  %v1113_v60 = vsub.s32 32, %v1112_v57  ;;  %v1115_v61 = vshll.u32 %v2281_v37, %v1112_v57  ;;  %v1118_v7 = vshll.u32 %v2282_v39, %v1112_v57 }
  0x7b   :  { %v1547_v8 = vmul.f32 -8.0, %v2731_v42  ;;  %v349_v46 = vmul.f32 %v348_v52, %v346_v33  ;;  %v1121_v14 = vshll.u32 %v2283_v41, %v1112_v57  ;;  %v738_v3 = vadd.s32 %v2695_v20, %v2701_v13 }
  0x7c   :  { %v745_v4 = vshll.u32 %v2735_v59, 30  ;;  %v1116_v62 = vshrl.u32 %v2282_v39, %v1113_v60  ;;  %v1119_v9 = vshrl.u32 %v2283_v41, %v1113_v60  ;;  %v1122_v15 = vshrl.u32 %v2284_v43, %v1113_v60 }
  0x7d   :  { %v1551_v2 = vmul.f32 %v1547_v8, %v2731_v42  ;;  %v350_v24 = vxor.u32 2147483648, %v349_v46  ;;  %v1114_v17 = vshrl.u32 %v2281_v37, %v1113_v60  ;;  %v2756_v19 = vshll.u32 %v1106_v63, 8 }
  0x7e   :  { %v2743_v18 = vsub.s32 %v742_v49, %v745_v4  ;;  %v1124_v50 = vshll.u32 %v2284_v43, %v1112_v57  ;;  %v1125_v28 = vshrl.u32 %v2285_v45, %v1113_v60  ;;  %v1117_v13 = vor.u32 %v1116_v62, %v1115_v61 }
  0x7f   :  { %v1556_v21 = vmul.f32 1.442695, %v1551_v2  ;;  %v351_v11 = vsel %vm268_vm6, %v350_v24, %v349_v46  ;;  %v1120_v30 = vor.u32 %v1119_v9, %v1118_v7  ;;  %v1127_v25 = vshll.u32 %v2285_v45, %v1112_v57 }
  0x80   :  { %v748_v35 = vsub.s32 0, %v2743_v18  ;;  %v354_v23 = vsel %vm2725_vm10, %v2467_v31, %v351_v11  ;;  %vm1578_vm12 = vcmask 130048   ;;  %vm684_vm13 = vcmp.lt.s32.totalorder %v2552_v38, 0 }
  0x81   :  { %2204 = vpow2.f32 %v1556_v21  ;;  %v1123_v36 = vor.u32 %v1122_v15, %v1121_v14  ;;  %v1126_v44 = vor.u32 %v1125_v28, %v1124_v50  ;;  %v1128_v34 = vshrl.u32 %v2286_v53, %v1113_v60 }
  0x82   :  { %v2017_v20 = vmin.u32 %v748_v35, %v2743_v18  ;;  %vm1130_vm11 = vcmp.lt.s32.totalorder %v1111_v40, 1  ;;  %2206 = vcosq.f32 %v354_v23  ;;  %v768_v47 = vsub.s32 4, %v2735_v59 }
  0x83   :  { %v477_v29 = vand.u32 2139095040, %v2766_v56  ;;  %v1129_v12 = vor.u32 %v1128_v34, %v1127_v25  ;;  %vm1131_vm14 = vcmp.lt.s32.totalorder %v1111_v40, 2  ;;  %vm1132_vm1 = vcmp.lt.s32.totalorder %v1111_v40, 3 }
  0x84   :  { %v750_v22 = vclz %v2017_v20  ;;  %vm1133_vm2 = vcmp.lt.s32.totalorder %v1111_v40, 4  ;;  %v1134_v32 = vsel %vm1130_vm11, %v1114_v17, %v1117_v13  ;;  %v1138_v49 = vsel %vm1130_vm11, %v1117_v13, %v1120_v30 }
  0x85   :  { %v1135_v1 = vsel %vm1133_vm2, %v1123_v36, 2102212464  ;;  %v1139_v6 = vsel %vm1133_vm2, %v1126_v44, 920167782  ;;  %v1142_v52 = vsel %vm1130_vm11, %v1120_v30, %v1123_v36  ;;  %v1143_v55 = vsel %vm1133_vm2, %v1129_v12, 1326507024 }
  0x86   :  { %v2018_v10 = vadd.s32 4294967294, %v750_v22  ;;  %v1136_v51 = vsel %vm1132_vm1, %v1120_v30, %v1135_v1  ;;  %2208 = vsinq.f32 %v354_v23  ;;  %v1140_v16 = vsel %vm1132_vm1, %v1123_v36, %v1139_v6 }
  0x87   :  { %v1144_v0 = vsel %vm1132_vm1, %v1126_v44, %v1143_v55  ;;  %v1137_v33 = vsel %vm1131_vm14, %v1134_v32, %v1136_v51  ;;  %v1141_v58 = vsel %vm1131_vm14, %v1138_v49, %v1140_v16  ;;  %v478_v63 = vshrl.u32 %v477_v29, 23 }
  0x88   :  { %vm2019_vm3 = vcmp.lt.s32.totalorder %v2018_v10, 0  ;;  %v1145_v60 = vsel %vm1131_vm14, %v1142_v52, %v1144_v0  ;;  %v2786_v62 = vmul.u32.u64.low %v2756_v19, %v1141_v58  ;;  %v2787_v7 = vmul.u32.u64.high %v2756_v19, %v1141_v58, %v2786_v62 }
  0x89   :  { %v753_v57 = vsel %vm2019_vm3, 0, %v2018_v10  ;;  %v2782_v24 = vmul.u32.u64.low %v2756_v19, %v1145_v60  ;;  %v2783_v61 = vmul.u32.u64.high %v2756_v19, %v1145_v60, %v2782_v24  ;;  %vm2797_vm4 = vcmp.le.f32.partialorder %v682_v48, 0.7853982 }
  0x8a   :  { %v754_v8 = vsub.s32 32, %v753_v57  ;;  %v755_v46 = vshll.u32 %v2743_v18, %v753_v57  ;;  %v758_v4 = vsub.s32 4294967266, %v753_v57  ;;  %v769_v18 = vsel %vm684_vm13, %v768_v47, %v2735_v59 }
  0x8b   :  { %v2205_v2 = vpop.eup %2204  ;;  %v2008_v14 = vadd.s32 4294967169, %v478_v63  ;;  %v771_v50 = vsel %vm2797_vm4, 0, %v769_v18  ;;  %vm1155_vm5 = vc.u32 %v2783_v61, %v2786_v62  ;;  %v1156_v48 = vadd.s32 1, %v2787_v7 }
  0x8c   :  { %v2790_v9 = vmul.f32 %v2205_v2, %v263_v54  ;;  %v756_v21 = vshrl.u32 %v738_v3, %v754_v8  ;;  %v759_v40 = vadd.s32 127, %v758_v4  ;;  %v2207_v15 = vpop.eup %2206  ;;  %v1153_v3 = vmul.u32 %v2756_v19, %v1137_v33 }
  0x8d   :  { %v474_v59 = vand.u32 2147483647, %v2766_v56  ;;  %v2811_v28 = vand.u32 3, %v2738_v27  ;;  %v1157_v30 = vsel %vm1155_vm5, %v1156_v48, %v2787_v7  ;;  %v484_v25 = vadd.s32 1, %v2008_v14  ;;  %v2820_v27 = vld [vmem:[%s3582_s1 + $0x30] sm:$0xff] }
  0x8e   :  { %v1582_v35 = vsel %vm1578_vm12, %v2790_v9, 0.0  ;;  %v757_v17 = vor.u32 %v756_v21, %v755_v46  ;;  %v760_v23 = vshll.u32 %v759_v40, 23  ;;  %v775_v44 = vadd.s32 3, %v771_v50 }
  0x8f   :  { %1583 = vadd.xlane.f32.xlu0 %v1582_v35  ;;  %v1158_v34 = vadd.s32 %v1157_v30, %v1153_v3  ;;  %v366_v22 = vxor.u32 2147483648, %v2207_v15  ;;  %v481_v47 = vand.u32 8388607, %v474_v59  ;;  %vm485_vm15 = vcmp.gt.s32.totalorder %v484_v25, 0 }
  0x90   :  { %v761_v20 = vor.u32 4788187, %v760_v23  ;;  %v764_v13 = vcvt.s32.f32 %v757_v17  ;;  %v2209_v19 = vpop.eup %2208  ;;  %vm365_vm6 = vcmp.eq.s32.totalorder %v2811_v28, 2  ;;  %v486_v10 = vsel %vm485_vm15, %v484_v25, 0 }
  0x91   :  { %v1159_v12 = vadd.s32 536870912, %v1158_v34  ;;  %vm362_vm7 = vcmp.eq.s32.totalorder %v2811_v28, 0  ;;  %v488_v32 = vand.u32 31, %v486_v10  ;;  %v363_v1 = vxor.u32 2147483648, %v2209_v19 }
  0x92   :  { %v762_v36 = vand.u32 2147483647, %v761_v20  ;;  %v2823_v51 = vand.u32 3, %v775_v44  ;;  %v367_v52 = vsel %vm365_vm6, %v366_v22, %v2209_v19  ;;  %v482_v55 = vor.u32 8388608, %v481_v47 }
  0x93   :  { %v2825_v6 = vshrl.u32 %v1159_v12, 30  ;;  %v489_v16 = vsub.s32 32, %v488_v32  ;;  %v893_v0 = vand.u32 2139095040, %v2820_v27  ;;  %v491_v33 = vshll.u32 %v2281_v37, %v488_v32 }
  0x94   :  { %v765_v29 = vmul.f32 %v764_v13, %v762_v36  ;;  %v494_v58 = vshll.u32 %v2282_v39, %v488_v32  ;;  %vm361_vm8 = vcmp.lt.s32.totalorder %v2811_v28, 2  ;;  %v487_v60 = vshrl.u32 %v486_v10, 5 }
  0x95   :  { %v1161_v57 = vshll.u32 %v2825_v6, 30  ;;  %v492_v8 = vshrl.u32 %v2282_v39, %v489_v16  ;;  %v495_v46 = vshrl.u32 %v2283_v41, %v489_v16  ;;  %v497_v4 = vshll.u32 %v2283_v41, %v488_v32 }
  0x96   :  { %v766_v49 = vxor.u32 2147483648, %v765_v29  ;;  %v364_v63 = vsel %vm362_vm7, %v2207_v15, %v363_v1  ;;  %v498_v24 = vshrl.u32 %v2284_v43, %v489_v16  ;;  %v500_v7 = vshll.u32 %v2284_v43, %v488_v32 }
  0x97   :  { %v2839_v2 = vsub.s32 %v1158_v34, %v1161_v57  ;;  %v490_v40 = vshrl.u32 %v2281_v37, %v489_v16  ;;  %v2847_v18 = vshll.u32 %v482_v55, 8  ;;  %v894_v14 = vshrl.u32 %v893_v0, 23 }
  0x98   :  { %v767_v54 = vsel %vm684_vm13, %v766_v49, %v765_v29  ;;  %v493_v17 = vor.u32 %v492_v8, %v491_v33  ;;  %v496_v23 = vor.u32 %v495_v46, %v494_v58  ;;  %v501_v15 = vshrl.u32 %v2285_v45, %v489_v16 }
  0x99   :  { %v770_v21 = vsel %vm2797_vm4, %v2552_v38, %v767_v54  ;;  %v1164_v35 = vsub.s32 0, %v2839_v2  ;;  %vm358_vm9 = vweird.f32 %v2467_v31  ;;  %vm1100_vm10 = vcmp.lt.s32.totalorder %v2677_v26, 0 }
  0x9a   :  { %v499_v3 = vor.u32 %v498_v24, %v497_v4  ;;  %v503_v50 = vshll.u32 %v2285_v45, %v488_v32  ;;  %v504_v11 = vshrl.u32 %v2286_v53, %v489_v16  ;;  %vm506_vm13 = vcmp.lt.s32.totalorder %v487_v60, 1 }
  0x9b   :  { %2210 = vcosq.f32 %v770_v21  ;;  %v2033_v48 = vmin.u32 %v1164_v35, %v2839_v2  ;;  %v1184_v20 = vsub.s32 4, %v2825_v6  ;;  %v502_v13 = vor.u32 %v501_v15, %v500_v7 }
  0x9c   :  { %2212 = vsinq.f32 %v770_v21  ;;  %v505_v30 = vor.u32 %v504_v11, %v503_v50  ;;  %vm508_vm11 = vcmp.lt.s32.totalorder %v487_v60, 3  ;;  %vm509_vm14 = vcmp.lt.s32.totalorder %v487_v60, 4 }
  0x9d   :  { %v1166_v25 = vclz %v2033_v48  ;;  %vm507_vm1 = vcmp.lt.s32.totalorder %v487_v60, 2  ;;  %v510_v19 = vsel %vm506_vm13, %v490_v40, %v493_v17  ;;  %v514_v36 = vsel %vm506_vm13, %v493_v17, %v496_v23 }
  0x9e   :  { %v511_v44 = vsel %vm509_vm14, %v499_v3, 2102212464  ;;  %v515_v34 = vsel %vm509_vm14, %v502_v13, 920167782  ;;  %v518_v22 = vsel %vm506_vm13, %v496_v23, %v499_v3  ;;  %v519_v47 = vsel %vm509_vm14, %v505_v30, 1326507024 }
  0x9f   :  { %v2034_v29 = vadd.s32 4294967294, %v1166_v25  ;;  %v512_v12 = vsel %vm508_vm11, %v496_v23, %v511_v44  ;;  %v516_v10 = vsel %vm508_vm11, %v499_v3, %v515_v34  ;;  %v520_v32 = vsel %vm508_vm11, %v502_v13, %v519_v47 }
  0xa0   :  { %v1154_v1 = vadd.s32 %v2786_v62, %v2783_v61  ;;  %v517_v49 = vsel %vm507_vm1, %v514_v36, %v516_v10  ;;  %v521_v55 = vsel %vm507_vm1, %v518_v22, %v520_v32  ;;  %v2024_v16 = vadd.s32 4294967169, %v894_v14 }
  0xa1   :  { %v368_v0 = vsel %vm361_vm8, %v364_v63, %v367_v52  ;;  %vm2035_vm2 = vcmp.lt.s32.totalorder %v2034_v29, 0  ;;  %v2864_v54 = vmul.u32.u64.low %v2847_v18, %v521_v55  ;;  %v2865_v57 = vmul.u32.u64.high %v2847_v18, %v521_v55, %v2864_v54 }
  0xa2   :  { %v1169_v33 = vsel %vm2035_vm2, 0, %v2034_v29  ;;  %v513_v58 = vsel %vm507_vm1, %v510_v19, %v512_v12  ;;  %v2869_v8 = vmul.u32.u64.low %v2847_v18, %v517_v49  ;;  %v2870_v46 = vmul.u32.u64.high %v2847_v18, %v517_v49, %v2869_v8 }
  0xa3   :  { %v1170_v61 = vsub.s32 32, %v1169_v33  ;;  %v1171_v62 = vshll.u32 %v2839_v2, %v1169_v33  ;;  %v1174_v4 = vsub.s32 4294967266, %v1169_v33  ;;  %v1185_v28 = vsel %vm1100_vm10, %v1184_v20, %v2825_v6 }
  0xa4   :  { %vm778_vm3 = vcmp.eq.s32.totalorder %v2823_v51, 0  ;;  %vm2880_vm4 = vcmp.le.f32.partialorder %v1098_v5, 0.7853982  ;;  %v890_v60 = vand.u32 2147483647, %v2820_v27  ;;  %v900_v63 = vadd.s32 1, %v2024_v16 }
  0xa5   :  { %v2211_v24 = vpop.eup %2210  ;;  %v369_v2 = vsel %vm358_vm9, nan, %v368_v0  ;;  %v1172_v7 = vshrl.u32 %v1154_v1, %v1170_v61  ;;  %v1175_v21 = vadd.s32 127, %v1174_v4  ;;  %v529_v40 = vmul.u32 %v2847_v18, %v513_v58 }
  0xa6   :  { %v2213_v6 = vpop.eup %2212  ;;  %v1187_v14 = vsel %vm2880_vm4, 0, %v1185_v28  ;;  %vm531_vm5 = vc.u32 %v2865_v57, %v2869_v8  ;;  %v532_v5 = vadd.s32 1, %v2870_v46  ;;  %vm901_vm15 = vcmp.gt.s32.totalorder %v900_v63, 0 }
  0xa7   :  { %vm781_vm6 = vcmp.eq.s32.totalorder %v2823_v51, 2  ;;  %v1173_v35 = vor.u32 %v1172_v7, %v1171_v62  ;;  %v1176_v17 = vshll.u32 %v1175_v21, 23  ;;  %v902_v31 = vsel %vm901_vm15, %v900_v63, 0 }
  0xa8   :  { %v2894_v23 = vmul.f32 %v369_v2, %v369_v2  ;;  %v533_v15 = vsel %vm531_vm5, %v532_v5, %v2870_v46  ;;  %v897_v18 = vand.u32 8388607, %v890_v60  ;;  %v904_v3 = vand.u32 31, %v902_v31 }
  0xa9   :  { %v1177_v50 = vor.u32 4788187, %v1176_v17  ;;  %v1180_v11 = vcvt.s32.f32 %v1173_v35  ;;  %v1191_v48 = vadd.s32 3, %v1187_v14  ;;  %v534_v20 = vadd.s32 %v533_v15, %v529_v40 }
  0xaa   :  { %vm777_vm7 = vcmp.lt.s32.totalorder %v2823_v51, 2  ;;  %v779_v13 = vxor.u32 2147483648, %v2213_v6  ;;  %v782_v30 = vxor.u32 2147483648, %v2211_v24  ;;  %v903_v25 = vshrl.u32 %v902_v31, 5 }
  0xab   :  { %v905_v19 = vsub.s32 32, %v904_v3  ;;  %v1178_v36 = vand.u32 2147483647, %v1177_v50  ;;  %v535_v44 = vadd.s32 536870912, %v534_v20  ;;  %v907_v34 = vshll.u32 %v2281_v37, %v904_v3  ;;  %v2940_v50 = vld [vmem:[%s3582_s1 + $0x50] sm:$0xff] }
  0xac   :  { %v910_v22 = vshll.u32 %v2282_v39, %v904_v3  ;;  %v913_v12 = vshll.u32 %v2283_v41, %v904_v3  ;;  %v916_v10 = vshll.u32 %v2284_v43, %v904_v3  ;;  %vm774_vm8 = vweird.f32 %v2552_v38 }
  0xad   :  { %v908_v47 = vshrl.u32 %v2282_v39, %v905_v19  ;;  %v911_v29 = vshrl.u32 %v2283_v41, %v905_v19  ;;  %v1181_v32 = vmul.f32 %v1180_v11, %v1178_v36  ;;  %v2907_v1 = vshrl.u32 %v535_v44, 30 }
  0xae   :  { %v914_v49 = vshrl.u32 %v2284_v43, %v905_v19  ;;  %v917_v55 = vshrl.u32 %v2285_v45, %v905_v19  ;;  %v2911_v16 = vand.u32 3, %v1191_v48  ;;  %v898_v0 = vor.u32 8388608, %v897_v18 }
  0xaf   :  { %v919_v54 = vshll.u32 %v2285_v45, %v904_v3  ;;  %v920_v33 = vshrl.u32 %v2286_v53, %v905_v19  ;;  %v780_v58 = vsel %vm778_vm3, %v2211_v24, %v779_v13  ;;  %v783_v46 = vsel %vm781_vm6, %v782_v30, %v2213_v6 }
  0xb0   :  { %v1182_v61 = vxor.u32 2147483648, %v1181_v32  ;;  %v537_v62 = vshll.u32 %v2907_v1, 30  ;;  %v906_v4 = vshrl.u32 %v2281_v37, %v905_v19  ;;  %v909_v28 = vor.u32 %v908_v47, %v907_v34 }
  0xb1   :  { %v912_v63 = vor.u32 %v911_v29, %v910_v22  ;;  %v918_v2 = vor.u32 %v917_v55, %v916_v10  ;;  %v915_v40 = vor.u32 %v914_v49, %v913_v12  ;;  %vm922_vm9 = vcmp.lt.s32.totalorder %v903_v25, 1 }
  0xb2   :  { %v1183_v7 = vsel %vm1100_vm10, %v1182_v61, %v1181_v32  ;;  %v2923_v21 = vsub.s32 %v534_v20, %v537_v62  ;;  %v921_v6 = vor.u32 %v920_v33, %v919_v54  ;;  %vm924_vm13 = vcmp.lt.s32.totalorder %v903_v25, 3 }
  0xb3   :  { %v1186_v24 = vsel %vm2880_vm4, %v2677_v26, %v1183_v7  ;;  %vm925_vm11 = vcmp.lt.s32.totalorder %v903_v25, 4  ;;  %vm923_vm14 = vcmp.lt.s32.totalorder %v903_v25, 2  ;;  %v930_v35 = vsel %vm922_vm9, %v909_v28, %v912_v63  ;;  %v2976_v7 = vld [vmem:[%s3582_s1 + $0x18] sm:$0xff] }
  0xb4   :  { %2214 = vcosq.f32 %v1186_v24  ;;  %v540_v14 = vsub.s32 0, %v2923_v21  ;;  %v927_v5 = vsel %vm925_vm11, %v915_v40, 2102212464  ;;  %v931_v17 = vsel %vm925_vm11, %v918_v2, 920167782 }
  0xb5   :  { %2216 = vsinq.f32 %v1186_v24  ;;  %v938_v31 = vshll.u32 %v898_v0, 8  ;;  %v784_v15 = vsel %vm777_vm7, %v780_v58, %v783_v46  ;;  %v926_v18 = vsel %vm922_vm9, %v906_v4, %v909_v28 }
  0xb6   :  { %v2009_v52 = vmin.u32 %v540_v14, %v2923_v21  ;;  %v932_v3 = vsel %vm924_vm13, %v915_v40, %v931_v17  ;;  %v928_v11 = vsel %vm924_vm13, %v912_v63, %v927_v5  ;;  %v934_v20 = vsel %vm922_vm9, %v912_v63, %v915_v40 }
  0xb7   :  { %v933_v48 = vsel %vm923_vm14, %v930_v35, %v932_v3  ;;  %v935_v51 = vsel %vm925_vm11, %v921_v6, 1326507024  ;;  %v785_v30 = vsel %vm774_vm8, nan, %v784_v15  ;;  %vm1190_vm10 = vweird.f32 %v2677_v26 }
  0xb8   :  { %v542_v13 = vclz %v2009_v52  ;;  %v936_v19 = vsel %vm924_vm13, %v918_v2, %v935_v51  ;;  %v2950_v36 = vmul.u32.u64.low %v938_v31, %v933_v48  ;;  %v2951_v44 = vmul.u32.u64.high %v938_v31, %v933_v48, %v2950_v36 }
  0xb9   :  { %v929_v22 = vsel %vm923_vm14, %v926_v18, %v928_v11  ;;  %v937_v47 = vsel %vm923_vm14, %v934_v20, %v936_v19  ;;  %v1309_v29 = vand.u32 2139095040, %v2940_v50  ;;  %vm1193_vm1 = vcmp.lt.s32.totalorder %v2911_v16, 2 }
  0xba   :  { %v2010_v34 = vadd.s32 4294967294, %v542_v13  ;;  %v1526_v38 = vmul.f32 0.28144774, %v2894_v23  ;;  %v2959_v12 = vmul.u32.u64.low %v938_v31, %v937_v47  ;;  %v2960_v10 = vmul.u32.u64.high %v938_v31, %v937_v47, %v2959_v12 }
  0xbb   :  { %vm1197_vm2 = vcmp.eq.s32.totalorder %v2911_v16, 2  ;;  %v530_v32 = vadd.s32 %v2869_v8, %v2865_v57  ;;  %v1310_v49 = vshrl.u32 %v1309_v29, 23  ;;  %v1518_v55 = vmul.f32 %v785_v30, %v785_v30 }
  0xbc   :  { %vm2011_vm3 = vcmp.lt.s32.totalorder %v2010_v34, 0  ;;  %vm476_vm4 = vcmp.lt.s32.totalorder %v2766_v56, 0  ;;  %v945_v0 = vmul.u32 %v938_v31, %v929_v22  ;;  %v948_v54 = vadd.s32 1, %v2951_v44 }
  0xbd   :  { %v545_v25 = vsel %vm2011_vm3, 0, %v2010_v34  ;;  %v2040_v61 = vadd.s32 4294967169, %v1310_v49  ;;  %vm1194_vm5 = vcmp.eq.s32.totalorder %v2911_v16, 0  ;;  %vm947_vm15 = vc.u32 %v2960_v10, %v2950_v36 }
  0xbe   :  { %v2215_v33 = vpop.eup %2214  ;;  %v546_v58 = vsub.s32 32, %v545_v25  ;;  %v547_v23 = vshll.u32 %v2923_v21, %v545_v25  ;;  %v550_v46 = vsub.s32 4294967266, %v545_v25  ;;  %v1306_v57 = vand.u32 2147483647, %v2940_v50 }
  0xbf   :  { %v2217_v62 = vpop.eup %2216  ;;  %v1198_v4 = vxor.u32 2147483648, %v2215_v33  ;;  %v949_v2 = vsel %vm947_vm15, %v948_v54, %v2951_v44  ;;  %v1530_v40 = vmul.f32 0.28144774, %v1518_v55  ;;  %v1316_v6 = vadd.s32 1, %v2040_v61 }
  0xc0   :  { %v1195_v8 = vxor.u32 2147483648, %v2217_v62  ;;  %v548_v28 = vshrl.u32 %v530_v32, %v546_v58  ;;  %v551_v63 = vadd.s32 127, %v550_v46  ;;  %v950_v24 = vadd.s32 %v949_v2, %v945_v0 }
  0xc1   :  { %v1199_v21 = vsel %vm1197_vm2, %v1198_v4, %v2217_v62  ;;  %v560_v17 = vsub.s32 4, %v2907_v1  ;;  %vm1317_vm6 = vcmp.gt.s32.totalorder %v1316_v6, 0  ;;  %v581_v52 = vand.u32 2139095040, %v2976_v7 }
  0xc2   :  { %v1196_v14 = vsel %vm1194_vm5, %v2215_v33, %v1195_v8  ;;  %v549_v5 = vor.u32 %v548_v28, %v547_v23  ;;  %v552_v35 = vshll.u32 %v551_v63, 23  ;;  %v951_v15 = vadd.s32 536870912, %v950_v24 }
  0xc3   :  { %v1200_v31 = vsel %vm1193_vm1, %v1196_v14, %v1199_v21  ;;  %v1318_v48 = vsel %vm1317_vm6, %v1316_v6, 0  ;;  %v1534_v51 = vadd.f32 %v1530_v40, %v1526_v38  ;;  %v561_v16 = vsel %vm476_vm4, %v560_v17, %v2907_v1 }
  0xc4   :  { %v1201_v18 = vsel %vm1190_vm10, nan, %v1200_v31  ;;  %v553_v3 = vor.u32 4788187, %v552_v35  ;;  %v556_v11 = vcvt.s32.f32 %v549_v5  ;;  %v2986_v13 = vshrl.u32 %v951_v15, 30 }
  0xc5   :  { %v1522_v20 = vmul.f32 %v1201_v18, %v1201_v18  ;;  %v1320_v30 = vand.u32 31, %v1318_v48  ;;  %vm2994_vm7 = vcmp.le.f32.partialorder %v474_v59, 0.7853982  ;;  %v1313_v29 = vand.u32 8388607, %v1306_v57 }
  0xc6   :  { %v554_v19 = vand.u32 2147483647, %v553_v3  ;;  %v953_v34 = vshll.u32 %v2986_v13, 30  ;;  %v582_v38 = vshrl.u32 %v581_v52, 23  ;;  %v563_v1 = vsel %vm2994_vm7, 0, %v561_v16 }
  0xc7   :  { %v1538_v44 = vmul.f32 0.28144774, %v1522_v20  ;;  %v1321_v22 = vsub.s32 32, %v1320_v30  ;;  %v1323_v49 = vshll.u32 %v2281_v37, %v1320_v30  ;;  %v1326_v0 = vshll.u32 %v2282_v39, %v1320_v30 }
  0xc8   :  { %v557_v47 = vmul.f32 %v556_v11, %v554_v19  ;;  %v954_v32 = vsub.s32 %v950_v24, %v953_v34  ;;  %v3009_v58 = vadd.s32 3, %v563_v1  ;;  %v1314_v23 = vor.u32 8388608, %v1313_v29 }
  0xc9   :  { %v3000_v12 = vadd.f32 %v1538_v44, %v1534_v51  ;;  %v1324_v55 = vshrl.u32 %v2282_v39, %v1321_v22  ;;  %v1327_v54 = vshrl.u32 %v2283_v41, %v1321_v22  ;;  %v2012_v46 = vadd.s32 4294967169, %v582_v38 }
  0xca   :  { %v956_v25 = vsub.s32 0, %v954_v32  ;;  %v558_v33 = vxor.u32 2147483648, %v557_v47  ;;  %v946_v62 = vadd.s32 %v2950_v36, %v2960_v10  ;;  %v1319_v8 = vshrl.u32 %v1318_v48, 5 }
  0xcb   :  { %v1546_v59 = vmul.f32 -8.0, %v3000_v12  ;;  %v1325_v28 = vor.u32 %v1324_v55, %v1323_v49  ;;  %v1329_v63 = vshll.u32 %v2283_v41, %v1320_v30  ;;  %v1330_v2 = vshrl.u32 %v2284_v43, %v1321_v22 }
  0xcc   :  { %v2025_v4 = vmin.u32 %v956_v25, %v954_v32  ;;  %v1332_v21 = vshll.u32 %v2284_v43, %v1320_v30  ;;  %v1328_v6 = vor.u32 %v1327_v54, %v1326_v0  ;;  %v1333_v14 = vshrl.u32 %v2285_v45, %v1321_v22  ;;  %v262_v54 = vld [vmem:[%s3582_s1 + $0x60] sm:$0xff] }
  0xcd   :  { %v1550_v61 = vmul.f32 %v1546_v59, %v3000_v12  ;;  %v559_v5 = vsel %vm476_vm4, %v558_v33, %v557_v47  ;;  %v1322_v35 = vshrl.u32 %v2281_v37, %v1321_v22  ;;  %v3021_v36 = vshll.u32 %v1314_v23, 8 }
  0xce   :  { %v958_v24 = vclz %v2025_v4  ;;  %v588_v10 = vadd.s32 1, %v2012_v46  ;;  %v1334_v31 = vor.u32 %v1333_v14, %v1332_v21  ;;  %v1335_v15 = vshll.u32 %v2285_v45, %v1320_v30 }
  0xcf   :  { %v1554_v40 = vmul.f32 1.442695, %v1550_v61  ;;  %v1331_v52 = vor.u32 %v1330_v2, %v1329_v63  ;;  %v1336_v18 = vshrl.u32 %v2286_v53, %v1321_v22  ;;  %vm1338_vm8 = vcmp.lt.s32.totalorder %v1319_v8, 1 }
  0xd0   :  { %v2026_v17 = vadd.s32 4294967294, %v958_v24  ;;  %vm1339_vm9 = vcmp.lt.s32.totalorder %v1319_v8, 2  ;;  %vm1340_vm11 = vcmp.lt.s32.totalorder %v1319_v8, 3  ;;  %vm1341_vm14 = vcmp.lt.s32.totalorder %v1319_v8, 4 }
  0xd1   :  { %2218 = vpow2.f32 %v1554_v40  ;;  %v1346_v3 = vsel %vm1338_vm8, %v1325_v28, %v1328_v6  ;;  %v1337_v48 = vor.u32 %v1336_v18, %v1335_v15  ;;  %v1343_v20 = vsel %vm1341_vm14, %v1331_v52, 2102212464 }
  0xd2   :  { %vm2027_vm13 = vcmp.lt.s32.totalorder %v2026_v17, 0  ;;  %v1347_v51 = vsel %vm1341_vm14, %v1334_v31, 920167782  ;;  %v1342_v34 = vsel %vm1338_vm8, %v1322_v35, %v1325_v28  ;;  %v1344_v30 = vsel %vm1340_vm11, %v1328_v6, %v1343_v20 }
  0xd3   :  { %v961_v11 = vsel %vm2027_vm13, 0, %v2026_v17  ;;  %v1348_v22 = vsel %vm1340_vm11, %v1331_v52, %v1347_v51  ;;  %v1350_v47 = vsel %vm1338_vm8, %v1328_v6, %v1331_v52  ;;  %v1351_v29 = vsel %vm1341_vm14, %v1337_v48, 1326507024 }
  0xd4   :  { %v962_v19 = vsub.s32 32, %v961_v11  ;;  %v963_v16 = vshll.u32 %v954_v32, %v961_v11  ;;  %v966_v44 = vsub.s32 4294967266, %v961_v11  ;;  %v1349_v49 = vsel %vm1339_vm9, %v1346_v3, %v1348_v22 }
  0xd5   :  { %v1352_v55 = vsel %vm1340_vm11, %v1334_v31, %v1351_v29  ;;  %v562_v32 = vsel %vm2994_vm7, %v2766_v56, %v559_v5  ;;  %v3037_v25 = vmul.u32.u64.low %v3021_v36, %v1349_v49  ;;  %v3038_v0 = vmul.u32.u64.high %v3021_v36, %v1349_v49, %v3037_v25 }
  0xd6   :  { %v964_v38 = vshrl.u32 %v946_v62, %v962_v19  ;;  %v967_v1 = vadd.s32 127, %v966_v44  ;;  %v1353_v59 = vsel %vm1339_vm9, %v1350_v47, %v1352_v55  ;;  %v1345_v46 = vsel %vm1339_vm9, %v1342_v34, %v1344_v30 }
  0xd7   :  { %vm589_vm10 = vcmp.gt.s32.totalorder %v588_v10, 0  ;;  %v3046_v61 = vmul.u32.u64.low %v3021_v36, %v1353_v59  ;;  %v3047_v26 = vmul.u32.u64.high %v3021_v36, %v1353_v59, %v3046_v61  ;;  %v578_v62 = vand.u32 2147483647, %v2976_v7 }
  0xd8   :  { %v965_v33 = vor.u32 %v964_v38, %v963_v16  ;;  %v968_v23 = vshll.u32 %v967_v1, 23  ;;  %v590_v4 = vsel %vm589_vm10, %v588_v10, 0  ;;  %2220 = vcosq.f32 %v562_v32 }
  0xd9   :  { %v976_v21 = vsub.s32 4, %v2986_v13  ;;  %v1361_v24 = vmul.u32 %v3021_v36, %v1345_v46  ;;  %v1364_v8 = vadd.s32 1, %v3038_v0  ;;  %v592_v6 = vand.u32 31, %v590_v4 }
  0xda   :  { %v969_v63 = vor.u32 4788187, %v968_v23  ;;  %v972_v2 = vcvt.s32.f32 %v965_v33  ;;  %2222 = vsinq.f32 %v562_v32  ;;  %vm892_vm1 = vcmp.lt.s32.totalorder %v2820_v27, 0 }
  0xdb   :  { %v2219_v28 = vpop.eup %2218  ;;  %vm1363_vm2 = vc.u32 %v3047_v26, %v3037_v25  ;;  %v585_v35 = vand.u32 8388607, %v578_v62  ;;  %v1566_v10 = vmul.f32 2.0, %v3000_v12  ;;  %v593_v31 = vsub.s32 32, %v592_v6 }
  0xdc   :  { %v3051_v40 = vmul.f32 %v2219_v28, %v262_v54  ;;  %v970_v14 = vand.u32 2147483647, %v969_v63  ;;  %v1365_v17 = vsel %vm1363_vm2, %v1364_v8, %v3038_v0  ;;  %v3065_v15 = vand.u32 3, %v3009_v58 }
  0xdd   :  { %v977_v52 = vsel %vm892_vm1, %v976_v21, %v2986_v13  ;;  %v1366_v18 = vadd.s32 %v1365_v17, %v1361_v24  ;;  %v595_v3 = vshll.u32 %v2281_v37, %v592_v6  ;;  %v596_v48 = vshrl.u32 %v2282_v39, %v593_v31 }
  0xde   :  { %v1579_v5 = vsel %vm1578_vm12, %v3051_v40, 0.0  ;;  %v973_v36 = vmul.f32 %v972_v2, %v970_v14  ;;  %v598_v12 = vshll.u32 %v2282_v39, %v592_v6  ;;  %v599_v20 = vshrl.u32 %v2283_v41, %v593_v31  ;;  %v3107_v14 = vld [vmem:[%s3582_s1 + $0x38] sm:$0xff] }
  0xdf   :  { %1580 = vadd.xlane.f32.xlu1 %v1579_v5  ;;  %v1367_v51 = vadd.s32 536870912, %v1366_v18  ;;  %v591_v19 = vshrl.u32 %v590_v4, 5  ;;  %v601_v16 = vshll.u32 %v2283_v41, %v592_v6  ;;  %v602_v58 = vshrl.u32 %v2284_v43, %v593_v31 }
  0xe0   :  { %v974_v11 = vxor.u32 2147483648, %v973_v36  ;;  %v1570_v44 = vmul.f32 1.442695, %v1566_v10  ;;  %vm3078_vm3 = vcmp.le.f32.partialorder %v890_v60, 0.7853982  ;;  %v586_v34 = vor.u32 8388608, %v585_v35 }
  0xe1   :  { %v604_v30 = vshll.u32 %v2284_v43, %v592_v6  ;;  %v979_v47 = vsel %vm3078_vm3, 0, %v977_v52  ;;  %v3087_v29 = vshrl.u32 %v1367_v51, 30  ;;  %v605_v38 = vshrl.u32 %v2285_v45, %v593_v31 }
  0xe2   :  { %v975_v22 = vsel %vm892_vm1, %v974_v11, %v973_v36  ;;  %v2221_v1 = vpop.eup %2220  ;;  %vm573_vm4 = vcmp.eq.s32.totalorder %v3065_v15, 2  ;;  %v597_v60 = vor.u32 %v596_v48, %v595_v3  ;;  %v600_v49 = vor.u32 %v599_v20, %v598_v12 }
  0xe3   :  { %v607_v55 = vshll.u32 %v2285_v45, %v592_v6  ;;  %v608_v32 = vshrl.u32 %v2286_v53, %v593_v31  ;;  %v1369_v59 = vshll.u32 %v3087_v29, 30  ;;  %v603_v0 = vor.u32 %v602_v58, %v601_v16 }
  0xe4   :  { %v606_v54 = vor.u32 %v605_v38, %v604_v30  ;;  %vm610_vm5 = vcmp.lt.s32.totalorder %v591_v19, 1  ;;  %v2223_v33 = vpop.eup %2222  ;;  %2224 = vpow2.f32 %v1570_v44  ;;  %vm612_vm15 = vcmp.lt.s32.totalorder %v591_v19, 3 }
  0xe5   :  { %v609_v23 = vor.u32 %v608_v32, %v607_v55  ;;  %vm613_vm6 = vcmp.lt.s32.totalorder %v591_v19, 4  ;;  %v978_v46 = vsel %vm3078_vm3, %v2820_v27, %v975_v22  ;;  %v3097_v61 = vsub.s32 %v1366_v18, %v1369_v59 }
  0xe6   :  { %v594_v4 = vshrl.u32 %v2281_v37, %v593_v31  ;;  %vm611_vm7 = vcmp.lt.s32.totalorder %v591_v19, 2  ;;  %v615_v28 = vsel %vm613_vm6, %v603_v0, 2102212464  ;;  %v618_v63 = vsel %vm610_vm5, %v597_v60, %v600_v49 }
  0xe7   :  { %v619_v2 = vsel %vm613_vm6, %v606_v54, 920167782  ;;  %v626_v21 = vshll.u32 %v586_v34, 8  ;;  %v571_v24 = vxor.u32 2147483648, %v2223_v33  ;;  %v574_v8 = vxor.u32 2147483648, %v2221_v1 }
  0xe8   :  { %v1372_v6 = vsub.s32 0, %v3097_v61  ;;  %v620_v5 = vsel %vm612_vm15, %v603_v0, %v619_v2  ;;  %2226 = vcosq.f32 %v978_v46  ;;  %v622_v10 = vsel %vm610_vm5, %v600_v49, %v603_v0 }
  0xe9   :  { %v621_v35 = vsel %vm611_vm7, %v618_v63, %v620_v5  ;;  %v623_v36 = vsel %vm613_vm6, %v609_v23, 1326507024  ;;  %v614_v31 = vsel %vm610_vm5, %v594_v4, %v597_v60  ;;  %v616_v52 = vsel %vm612_vm15, %v600_v49, %v615_v28 }
  0xea   :  { %v2041_v17 = vmin.u32 %v1372_v6, %v3097_v61  ;;  %v624_v18 = vsel %vm612_vm15, %v606_v54, %v623_v36  ;;  %v3118_v11 = vmul.u32.u64.low %v626_v21, %v621_v35  ;;  %v3119_v48 = vmul.u32.u64.high %v626_v21, %v621_v35, %v3118_v11 }
  0xeb   :  { %v625_v3 = vsel %vm611_vm7, %v622_v10, %v624_v18  ;;  %v997_v12 = vand.u32 2139095040, %v3107_v14  ;;  %vm570_vm8 = vcmp.eq.s32.totalorder %v3065_v15, 0  ;;  %2228 = vsinq.f32 %v978_v46 }
  0xec   :  { %v983_v20 = vadd.s32 3, %v979_v47  ;;  %v1374_v51 = vclz %v2041_v17  ;;  %v617_v16 = vsel %vm611_vm7, %v614_v31, %v616_v52  ;;  %v1567_v34 = vmul.f32 2.0, %v2731_v42  ;;  %v3172_v17 = vld [vmem:[%s3582_s1 + $0x58] sm:$0xff] }
  0xed   :  { %v3125_v58 = vmul.u32.u64.low %v626_v21, %v625_v3  ;;  %v3126_v44 = vmul.u32.u64.high %v626_v21, %v625_v3, %v3125_v58  ;;  %v998_v13 = vshrl.u32 %v997_v12, 23  ;;  %vm569_vm9 = vcmp.lt.s32.totalorder %v3065_v15, 2 }
  0xee   :  { %v575_v30 = vsel %vm573_vm4, %v574_v8, %v2223_v33  ;;  %v2042_v22 = vadd.s32 4294967294, %v1374_v51  ;;  %v3132_v38 = vpop.eup %2224  ;;  %v572_v60 = vsel %vm570_vm8, %v2221_v1, %v571_v24  ;;  %v1392_v47 = vsub.s32 4, %v3087_v29 }
  0xef   :  { %v636_v19 = vadd.s32 1, %v3119_v48  ;;  %v2028_v49 = vadd.s32 4294967169, %v998_v13  ;;  %vm566_vm13 = vweird.f32 %v2766_v56  ;;  %v1362_v55 = vadd.s32 %v3037_v25, %v3047_v26 }
  0xf0   :  { %vm2043_vm11 = vcmp.lt.s32.totalorder %v2042_v22, 0  ;;  %v633_v42 = vmul.u32 %v626_v21, %v617_v16  ;;  %v3139_v32 = vand.u32 3, %v983_v20  ;;  %vm1308_vm14 = vcmp.lt.s32.totalorder %v2940_v50, 0 }
  0xf1   :  { %v1377_v59 = vsel %vm2043_vm11, 0, %v2042_v22  ;;  %vm635_vm10 = vc.u32 %v3126_v44, %v3118_v11  ;;  %v576_v1 = vsel %vm569_vm9, %v572_v60, %v575_v30  ;;  %v1393_v25 = vsel %vm1308_vm14, %v1392_v47, %v3087_v29 }
  0xf2   :  { %v1378_v0 = vsub.s32 32, %v1377_v59  ;;  %v1379_v54 = vshll.u32 %v3097_v61, %v1377_v59  ;;  %v1382_v33 = vsub.s32 4294967266, %v1377_v59  ;;  %v2227_v23 = vpop.eup %2226  ;;  %v637_v26 = vsel %vm635_vm10, %v636_v19, %v3119_v48 }
  0xf3   :  { %v994_v46 = vand.u32 2147483647, %v3107_v14  ;;  %v1004_v4 = vadd.s32 1, %v2028_v49  ;;  %v638_v2 = vadd.s32 %v637_v26, %v633_v42  ;;  %v3152_v21 = vmul.f32 1.442695, %v1567_v34 }
  0xf4   :  { %v1380_v28 = vshrl.u32 %v1362_v55, %v1378_v0  ;;  %v1383_v63 = vadd.s32 127, %v1382_v33  ;;  %v577_v15 = vsel %vm566_vm13, nan, %v576_v1  ;;  %vm3158_vm1 = vcmp.le.f32.partialorder %v1306_v57, 0.7853982 }
  0xf5   :  { %vm1005_vm2 = vcmp.gt.s32.totalorder %v1004_v4, 0  ;;  %v2229_v29 = vpop.eup %2228  ;;  %v1395_v6 = vsel %vm3158_vm1, 0, %v1393_v25  ;;  %v639_v5 = vadd.s32 536870912, %v638_v2  ;;  %vm985_vm3 = vcmp.lt.s32.totalorder %v3139_v32, 2 }
  0xf6   :  { %v1381_v24 = vor.u32 %v1380_v28, %v1379_v54  ;;  %v1384_v8 = vshll.u32 %v1383_v63, 23  ;;  %vm986_vm4 = vcmp.eq.s32.totalorder %v3139_v32, 0  ;;  %v990_v56 = vxor.u32 2147483648, %v2227_v23 }
  0xf7   :  { %v1001_v35 = vand.u32 8388607, %v994_v46  ;;  %v1006_v57 = vsel %vm1005_vm2, %v1004_v4, 0  ;;  %vm989_vm5 = vcmp.eq.s32.totalorder %v3139_v32, 2  ;;  %v3174_v31 = vshrl.u32 %v639_v5, 30 }
  0xf8   :  { %v1385_v10 = vor.u32 4788187, %v1384_v8  ;;  %v1388_v36 = vcvt.s32.f32 %v1381_v24  ;;  %v1399_v52 = vadd.s32 3, %v1395_v6  ;;  %v3176_v18 = vmul.f32 %v577_v15, %v577_v15 }
  0xf9   :  { %v1008_v3 = vand.u32 31, %v1006_v57  ;;  %v1410_v48 = vand.u32 2147483647, %v3172_v17  ;;  %v987_v12 = vxor.u32 2147483648, %v2229_v29  ;;  %v641_v51 = vshll.u32 %v3174_v31, 30 }
  0xfa   :  { %v1386_v20 = vand.u32 2147483647, %v1385_v10  ;;  %v3182_v16 = vmul.f32 %v3132_v38, %v3051_v40  ;;  %v991_v58 = vsel %vm989_vm5, %v990_v56, %v2229_v29  ;;  %v1002_v13 = vor.u32 8388608, %v1001_v35 }
  0xfb   :  { %v1009_v34 = vsub.s32 32, %v1008_v3  ;;  %v1413_v30 = vand.u32 2139095040, %v3172_v17  ;;  %vm982_vm15 = vweird.f32 %v2820_v27  ;;  %v3186_v60 = vsub.s32 %v638_v2, %v641_v51 }
  0xfc   :  { %v1389_v22 = vmul.f32 %v1388_v36, %v1386_v20  ;;  %v1011_v47 = vshll.u32 %v2281_v37, %v1008_v3  ;;  %v1014_v19 = vshll.u32 %v2282_v39, %v1008_v3  ;;  %v1017_v40 = vshll.u32 %v2283_v41, %v1008_v3 }
  0xfd   :  { %v1012_v49 = vshrl.u32 %v2282_v39, %v1009_v34  ;;  %v1015_v55 = vshrl.u32 %v2283_v41, %v1009_v34  ;;  %v1020_v42 = vshll.u32 %v2284_v43, %v1008_v3  ;;  %v644_v1 = vsub.s32 0, %v3186_v60 }
  0xfe   :  { %v1390_v59 = vxor.u32 2147483648, %v1389_v22  ;;  %v1007_v0 = vshrl.u32 %v1006_v57, 5  ;;  %v1018_v54 = vshrl.u32 %v2284_v43, %v1009_v34  ;;  %v988_v33 = vsel %vm986_vm4, %v2227_v23, %v987_v12 }
  0xff   :  { %v1010_v25 = vshrl.u32 %v2281_v37, %v1009_v34  ;;  %v1021_v26 = vshrl.u32 %v2285_v45, %v1009_v34  ;;  %v1023_v4 = vshll.u32 %v2285_v45, %v1008_v3  ;;  %v2013_v63 = vmin.u32 %v644_v1, %v3186_v60 }
 0x100   :  { %v1391_v28 = vsel %vm1308_vm14, %v1390_v59, %v1389_v22  ;;  %v1013_v2 = vor.u32 %v1012_v49, %v1011_v47  ;;  %v1016_v15 = vor.u32 %v1015_v55, %v1014_v19  ;;  %v1019_v24 = vor.u32 %v1018_v54, %v1017_v40 }
 0x101   :  { %v1394_v29 = vsel %vm3158_vm1, %v2940_v50, %v1391_v28  ;;  %v1022_v8 = vor.u32 %v1021_v26, %v1020_v42  ;;  %v1024_v23 = vshrl.u32 %v2286_v53, %v1009_v34  ;;  %v992_v6 = vsel %vm985_vm3, %v988_v33, %v991_v58 }
 0x102   :  { %2230 = vcosq.f32 %v1394_v29  ;;  %vm1026_vm6 = vcmp.lt.s32.totalorder %v1007_v0, 1  ;;  %v1414_v5 = vshrl.u32 %v1413_v30, 23  ;;  %v646_v56 = vclz %v2013_v63 }
 0x103   :  { %2232 = vsinq.f32 %v1394_v29  ;;  %v1025_v35 = vor.u32 %v1024_v23, %v1023_v4  ;;  %v1042_v57 = vshll.u32 %v1002_v13, 8  ;;  %vm1027_vm7 = vcmp.lt.s32.totalorder %v1007_v0, 2 }
 0x104   :  { %vm1028_vm8 = vcmp.lt.s32.totalorder %v1007_v0, 3  ;;  %vm1029_vm9 = vcmp.lt.s32.totalorder %v1007_v0, 4  ;;  %v1030_v10 = vsel %vm1026_vm6, %v1010_v25, %v1013_v2  ;;  %v1034_v36 = vsel %vm1026_vm6, %v1013_v2, %v1016_v15 }
 0x105   :  { %v1031_v61 = vsel %vm1029_vm9, %v1019_v24, 2102212464  ;;  %v1035_v3 = vsel %vm1029_vm9, %v1022_v8, 920167782  ;;  %v1038_v12 = vsel %vm1026_vm6, %v1016_v15, %v1019_v24  ;;  %v1039_v34 = vsel %vm1029_vm9, %v1025_v35, 1326507024 }
 0x106   :  { %v1032_v20 = vsel %vm1028_vm8, %v1016_v15, %v1031_v61  ;;  %v1036_v51 = vsel %vm1028_vm8, %v1019_v24, %v1035_v3  ;;  %v2044_v32 = vadd.s32 4294967169, %v1414_v5  ;;  %v993_v58 = vsel %vm982_vm15, nan, %v992_v6 }
 0x107   :  { %v1400_v30 = vand.u32 3, %v1399_v52  ;;  %v1037_v22 = vsel %vm1027_vm7, %v1034_v36, %v1036_v51  ;;  %v1040_v47 = vsel %vm1028_vm8, %v1022_v8, %v1039_v34  ;;  %v2014_v13 = vadd.s32 4294967294, %v646_v56 }
 0x108   :  { %v1033_v19 = vsel %vm1027_vm7, %v1030_v10, %v1032_v20  ;;  %v1041_v49 = vsel %vm1027_vm7, %v1038_v12, %v1040_v47  ;;  %v3218_v42 = vmul.u32.u64.low %v1042_v57, %v1037_v22  ;;  %v3219_v59 = vmul.u32.u64.high %v1042_v57, %v1037_v22, %v3218_v42 }
 0x109   :  { %v3215_v55 = vmul.u32.u64.low %v1042_v57, %v1041_v49  ;;  %v3216_v40 = vmul.u32.u64.high %v1042_v57, %v1041_v49, %v3215_v55  ;;  %2234 = vpow2.f32 %v3152_v21  ;;  %v1520_v27 = vmul.f32 %v993_v58, %v993_v58 }
 0x10a   :  { %v1417_v52 = vand.u32 8388607, %v1410_v48  ;;  %v1420_v1 = vadd.s32 1, %v2044_v32  ;;  %vm1398_vm13 = vweird.f32 %v2940_v50  ;;  %vm1401_vm11 = vcmp.lt.s32.totalorder %v1400_v30, 2 }
 0x10b   :  { %v1528_v0 = vmul.f32 0.28144774, %v3176_v18  ;;  %v3229_v54 = vmul.f32 %v3132_v38, %v3182_v16  ;;  %vm1405_vm14 = vcmp.eq.s32.totalorder %v1400_v30, 2  ;;  %vm2015_vm10 = vcmp.lt.s32.totalorder %v2014_v13, 0 }
 0x10c   :  { %v2231_v33 = vpop.eup %2230  ;;  %v1049_v25 = vmul.u32 %v1042_v57, %v1033_v19  ;;  %vm1421_vm1 = vcmp.gt.s32.totalorder %v1420_v1, 0  ;;  %vm1402_vm2 = vcmp.eq.s32.totalorder %v1400_v30, 0  ;;  %vm1051_vm3 = vc.u32 %v3216_v40, %v3218_v42 }
 0x10d   :  { %v2233_v21 = vpop.eup %2232  ;;  %v1406_v26 = vxor.u32 2147483648, %v2231_v33  ;;  %v1052_v4 = vadd.s32 1, %v3219_v59  ;;  %v1532_v63 = vmul.f32 0.28144774, %v1520_v27  ;;  %v1418_v18 = vor.u32 8388608, %v1417_v52 }
 0x10e   :  { %v1403_v28 = vxor.u32 2147483648, %v2233_v21  ;;  %v1422_v2 = vsel %vm1421_vm1, %v1420_v1, 0  ;;  %v3234_v29 = vsel %vm2015_vm10, 0, %v2014_v13  ;;  %v634_v6 = vadd.s32 %v3118_v11, %v3126_v44 }
 0x10f   :  { %v1407_v15 = vsel %vm1405_vm14, %v1406_v26, %v2233_v21  ;;  %v1053_v24 = vsel %vm1051_vm3, %v1052_v4, %v3219_v59  ;;  %v1424_v8 = vand.u32 31, %v1422_v2  ;;  %v650_v5 = vsub.s32 32, %v3234_v29 }
 0x110   :  { %v1404_v23 = vsel %vm1402_vm2, %v2231_v33, %v1403_v28  ;;  %v1054_v56 = vadd.s32 %v1053_v24, %v1049_v25  ;;  %v1536_v3 = vadd.f32 %v1532_v63, %v1528_v0  ;;  %v3243_v12 = vshll.u32 %v1418_v18, 8 }
 0x111   :  { %v1408_v35 = vsel %vm1401_vm11, %v1404_v23, %v1407_v15  ;;  %v1425_v61 = vsub.s32 32, %v1424_v8  ;;  %v651_v51 = vshll.u32 %v3186_v60, %v3234_v29  ;;  %v652_v11 = vshrl.u32 %v634_v6, %v650_v5 }
 0x112   :  { %v1409_v57 = vsel %vm1398_vm13, nan, %v1408_v35  ;;  %v1055_v10 = vadd.s32 536870912, %v1054_v56  ;;  %v654_v44 = vsub.s32 4294967266, %v3234_v29  ;;  %v1427_v50 = vshll.u32 %v2281_v37, %v1424_v8 }
 0x113   :  { %v1524_v36 = vmul.f32 %v1409_v57, %v1409_v57  ;;  %v3245_v20 = vpop.eup %2234  ;;  %v1430_v58 = vshll.u32 %v2282_v39, %v1424_v8  ;;  %v1433_v30 = vshll.u32 %v2283_v41, %v1424_v8  ;;  %v1428_v47 = vshrl.u32 %v2282_v39, %v1425_v61 }
 0x114   :  { %v3250_v34 = vshrl.u32 %v1055_v10, 30  ;;  %v1431_v13 = vshrl.u32 %v2283_v41, %v1425_v61  ;;  %v1434_v60 = vshrl.u32 %v2284_v43, %v1425_v61  ;;  %v1423_v49 = vshrl.u32 %v1422_v2, 5 }
 0x115   :  { %v1540_v32 = vmul.f32 0.28144774, %v1524_v36  ;;  %v1436_v55 = vshll.u32 %v2284_v43, %v1424_v8  ;;  %v1437_v59 = vshrl.u32 %v2285_v45, %v1425_v61  ;;  %v655_v27 = vadd.s32 127, %v654_v44 }
 0x116   :  { %v1057_v22 = vshll.u32 %v3250_v34, 30  ;;  %v1439_v1 = vshll.u32 %v2285_v45, %v1424_v8  ;;  %v1440_v0 = vshrl.u32 %v2286_v53, %v1425_v61  ;;  %v1426_v39 = vshrl.u32 %v2281_v37, %v1425_v61 }
 0x117   :  { %v1544_v19 = vadd.f32 %v1540_v32, %v1536_v3  ;;  %v3266_v41 = vmul.f32 %v3245_v20, %v2790_v9  ;;  %v1429_v26 = vor.u32 %v1428_v47, %v1427_v50  ;;  %v1432_v4 = vor.u32 %v1431_v13, %v1430_v58 }
 0x118   :  { %v1058_v52 = vsub.s32 %v1054_v56, %v1057_v22  ;;  %v1435_v43 = vor.u32 %v1434_v60, %v1433_v30  ;;  %v1438_v18 = vor.u32 %v1437_v59, %v1436_v55  ;;  %vm1442_vm4 = vcmp.lt.s32.totalorder %v1423_v49, 1  ;;  %v264_v59 = vld [vmem:[%s3582_s1 + $0x70] sm:$0xff] }
 0x119   :  { %v1548_v33 = vmul.f32 -8.0, %v1544_v19  ;;  %v1568_v25 = vmul.f32 2.0, %v1544_v19  ;;  %v656_v2 = vshll.u32 %v655_v27, 23  ;;  %v1441_v15 = vor.u32 %v1440_v0, %v1439_v1 }
 0x11a   :  { %v1060_v21 = vsub.s32 0, %v1058_v52  ;;  %vm1445_vm5 = vcmp.lt.s32.totalorder %v1423_v49, 4  ;;  %vm1443_vm15 = vcmp.lt.s32.totalorder %v1423_v49, 2  ;;  %vm1444_vm6 = vcmp.lt.s32.totalorder %v1423_v49, 3 }
 0x11b   :  { %v1552_v28 = vmul.f32 %v1548_v33, %v1544_v19  ;;  %v1574_v63 = vmul.f32 1.442695, %v1568_v25  ;;  %v1447_v37 = vsel %vm1445_vm5, %v1435_v43, 2102212464  ;;  %v1446_v29 = vsel %vm1442_vm4, %v1426_v39, %v1429_v26 }
 0x11c   :  { %v2029_v45 = vmin.u32 %v1060_v21, %v1058_v52  ;;  %v1450_v24 = vsel %vm1442_vm4, %v1429_v26, %v1432_v4  ;;  %v1448_v8 = vsel %vm1444_vm6, %v1432_v4, %v1447_v37  ;;  %v1451_v23 = vsel %vm1445_vm5, %v1438_v18, 920167782 }
 0x11d   :  { %v1558_v53 = vmul.f32 1.442695, %v1552_v28  ;;  %2236 = vpow2.f32 %v1574_v63  ;;  %v1454_v6 = vsel %vm1442_vm4, %v1432_v4, %v1435_v43  ;;  %v653_v5 = vor.u32 %v652_v11, %v651_v51 }
 0x11e   :  { %v1062_v9 = vclz %v2029_v45  ;;  %v1452_v35 = vsel %vm1444_vm6, %v1435_v43, %v1451_v23  ;;  %v1455_v57 = vsel %vm1445_vm5, %v1441_v15, 1326507024  ;;  %v1050_v10 = vadd.s32 %v3218_v42, %v3216_v40 }
 0x11f   :  { %2238 = vpow2.f32 %v1558_v53  ;;  %v1449_v61 = vsel %vm1443_vm15, %v1446_v29, %v1448_v8  ;;  %v1453_v36 = vsel %vm1443_vm15, %v1450_v24, %v1452_v35  ;;  %v1456_v3 = vsel %vm1444_vm6, %v1438_v18, %v1455_v57 }
 0x120   :  { %v2030_v56 = vadd.s32 4294967294, %v1062_v9  ;;  %v1457_v44 = vsel %vm1443_vm15, %v1454_v6, %v1456_v3  ;;  %v3283_v32 = vmul.u32.u64.low %v3243_v12, %v1453_v36  ;;  %v3284_v51 = vmul.u32.u64.high %v3243_v12, %v1453_v36, %v3283_v32 }
 0x121   :  { %v657_v11 = vor.u32 4788187, %v656_v2  ;;  %v3288_v58 = vmul.u32.u64.low %v3243_v12, %v1457_v44  ;;  %v3289_v30 = vmul.u32.u64.high %v3243_v12, %v1457_v44, %v3288_v58  ;;  %v1465_v47 = vmul.u32 %v3243_v12, %v1449_v61 }
 0x122   :  { %vm2031_vm7 = vcmp.lt.s32.totalorder %v2030_v56, 0  ;;  %v3294_v13 = vmul.f32 %v3245_v20, %v3266_v41  ;;  %v3298_v60 = vmul.f32 %v3132_v38, %v3229_v54  ;;  %v1468_v55 = vadd.s32 1, %v3284_v51 }
 0x123   :  { %v1065_v50 = vsel %vm2031_vm7, 0, %v2030_v56  ;;  %v658_v27 = vand.u32 2147483647, %v657_v11  ;;  %vm1467_vm8 = vc.u32 %v3289_v30, %v3283_v32  ;;  %v1595_v8 = vsel %vm1578_vm12, %v3182_v16, 0.0 }
 0x124   :  { %v1066_v40 = vsub.s32 32, %v1065_v50  ;;  %v1067_v42 = vshll.u32 %v1058_v52, %v1065_v50  ;;  %v1070_v22 = vsub.s32 4294967266, %v1065_v50  ;;  %v660_v52 = vcvt.s32.f32 %v653_v5 }
 0x125   :  { %v1469_v33 = vsel %vm1467_vm8, %v1468_v55, %v3284_v51  ;;  %v3309_v21 = vmul.f32 %v3245_v20, %v3294_v13  ;;  %v3313_v28 = vmul.f32 %v3132_v38, %v3298_v60  ;;  %vm580_vm9 = vcmp.lt.s32.totalorder %v2976_v7, 0 }
 0x126   :  { %v1068_v19 = vshrl.u32 %v1050_v10, %v1066_v40  ;;  %v1071_v49 = vadd.s32 127, %v1070_v22  ;;  %v1470_v39 = vadd.s32 %v1469_v33, %v1465_v47  ;;  %v661_v63 = vmul.f32 %v660_v52, %v658_v27 }
 0x127   :  { %v2237_v12 = vpop.eup %2236  ;;  %v3317_v2 = vmul.f32 %v3245_v20, %v3309_v21  ;;  %v3330_v29 = vmul.f32 %v3132_v38, %v3313_v28  ;;  %vm996_vm13 = vcmp.lt.s32.totalorder %v3107_v14, 0  ;;  %v1598_v61 = vsel %vm1578_vm12, %v3266_v41, 0.0 }
 0x128   :  { %v1069_v1 = vor.u32 %v1068_v19, %v1067_v42  ;;  %v1072_v0 = vshll.u32 %v1071_v49, 23  ;;  %v1471_v18 = vadd.s32 536870912, %v1470_v39  ;;  %v662_v6 = vxor.u32 2147483648, %v661_v63 }
 0x129   :  { %v2239_v25 = vpop.eup %2238  ;;  %v3326_v9 = vmul.f32 %v3245_v20, %v3317_v2  ;;  %v3344_v35 = vmul.f32 %v3132_v38, %v3330_v29  ;;  %vm3358_vm11 = vcmp.le.f32.partialorder %v578_v62, 0.7853982  ;;  %vm3373_vm14 = vcmp.le.f32.partialorder %v994_v46, 0.7853982 }
 0x12a   :  { %v1564_v26 = vmul.f32 %v2239_v25, %v264_v59  ;;  %v1073_v4 = vor.u32 4788187, %v1072_v0  ;;  %v1076_v43 = vcvt.s32.f32 %v1069_v1  ;;  %v3322_v37 = vshrl.u32 %v1471_v18, 30 }
 0x12b   :  { %v3348_v16 = vmul.f32 %v3245_v20, %v3326_v9  ;;  %v663_v44 = vsel %vm580_vm9, %v662_v6, %v661_v63  ;;  %v3369_v50 = vmul.f32 %v3132_v38, %v3344_v35  ;;  %v664_v40 = vsub.s32 4, %v3174_v31 }
 0x12c   :  { %v1585_v45 = vsel %vm1578_vm12, %v1564_v26, 0.0  ;;  %v1074_v15 = vand.u32 2147483647, %v1073_v4  ;;  %v3320_v53 = vmul.f32 %v2237_v12, %v1564_v26  ;;  %v1473_v5 = vshll.u32 %v3322_v37, 30 }
 0x12d   :  { %1586 = vadd.xlane.f32.xlu0 %v1585_v45  ;;  %v666_v42 = vsel %vm3358_vm11, %v2976_v7, %v663_v44  ;;  %v3388_v46 = vmul.f32 %v3245_v20, %v3348_v16  ;;  %v1080_v47 = vsub.s32 4, %v3250_v34  ;;  %v665_v59 = vsel %vm580_vm9, %v664_v40, %v3174_v31 }
 0x12e   :  { %v1077_v24 = vmul.f32 %v1076_v43, %v1074_v15  ;;  %v3335_v23 = vmul.f32 %v2237_v12, %v3320_v53  ;;  %v1474_v10 = vsub.s32 %v1470_v39, %v1473_v5  ;;  %2240 = vcosq.f32 %v666_v42 }
 0x12f   :  { %2242 = vsinq.f32 %v666_v42  ;;  %v1466_v20 = vadd.s32 %v3283_v32, %v3289_v30  ;;  %v1081_v27 = vsel %vm996_vm13, %v1080_v47, %v3250_v34  ;;  %vm3412_vm1 = vcmp.le.f32.partialorder %v1410_v48, 0.7853982 }
 0x130   :  { %v3340_v56 = vmul.f32 %v2237_v12, %v3335_v23  ;;  %v1078_v57 = vxor.u32 2147483648, %v1077_v24  ;;  %v1476_v51 = vsub.s32 0, %v1474_v10  ;;  %v1083_v7 = vsel %vm3373_vm14, 0, %v1081_v27 }
 0x131   :  { %1596 = vadd.xlane.f32.xlu0 %v1595_v8  ;;  %v1087_v26 = vadd.s32 3, %v1083_v7  ;;  %vm1412_vm3 = vcmp.lt.s32.totalorder %v3172_v17, 0  ;;  %vm1086_vm9 = vweird.f32 %v3107_v14 }
 0x132   :  { %v3354_v36 = vmul.f32 %v2237_v12, %v3340_v56  ;;  %v1079_v62 = vsel %vm996_vm13, %v1078_v57, %v1077_v24  ;;  %v2045_v58 = vmin.u32 %v1476_v51, %v1474_v10  ;;  %v1496_v24 = vsub.s32 4, %v3322_v37 }
 0x133   :  { %v1082_v19 = vsel %vm3373_vm14, %v3107_v14, %v1079_v62  ;;  %v1088_v6 = vand.u32 3, %v1087_v26 }
 0x134   :  { %v3365_v11 = vmul.f32 %v2237_v12, %v3354_v36  ;;  %v1478_v22 = vclz %v2045_v58  ;;  %2244 = vcosq.f32 %v1082_v19  ;;  %v1497_v41 = vsel %vm1412_vm3, %v1496_v24, %v3322_v37 }
 0x135   :  { %1599 = vadd.xlane.f32.xlu0 %v1598_v61  ;;  %2246 = vsinq.f32 %v1082_v19  ;;  %vm1090_vm5 = vcmp.eq.s32.totalorder %v1088_v6, 0  ;;  %vm1093_vm15 = vcmp.eq.s32.totalorder %v1088_v6, 2  ;;  %vm1089_vm7 = vcmp.lt.s32.totalorder %v1088_v6, 2  ;;  %v2256_v19 = vld [vmem:[%s3582_s1 + $0x18] sm:$0xff] }
 0x136   :  { %v3384_v38 = vmul.f32 %v2237_v12, %v3365_v11  ;;  %v2046_v55 = vadd.s32 4294967294, %v1478_v22  ;;  %v1499_v40 = vsel %vm3412_vm1, 0, %v1497_v41  ;;  %vm670_vm8 = vweird.f32 %v2256_v19 }
 0x137   :  { %v1503_v37 = vadd.s32 3, %v1499_v40  ;;  %v1615_v41 = vsel %vm1578_vm12, %v3229_v54, 0.0  ;;  %v1655_v54 = vsel %vm1578_vm12, %v3313_v28, 0.0  ;;  %v1661_v28 = vsel %vm1578_vm12, %v3354_v36, 0.0 }
 0x138   :  { %v3395_v49 = vmul.f32 %v2237_v12, %v3384_v38  ;;  %vm2047_vm10 = vcmp.lt.s32.totalorder %v2046_v55, 0  ;;  %v667_v12 = vsel %vm3358_vm11, 0, %v665_v59  ;;  %v2241_v4 = vpop.eup %2240  ;;  %v1715_v36 = vsel %vm1578_vm12, %v3369_v50, 0.0 }
 0x139   :  { %v1481_v52 = vsel %vm2047_vm10, 0, %v2046_v55  ;;  %v671_v39 = vadd.s32 3, %v667_v12  ;;  %v2243_v63 = vpop.eup %2242  ;;  %v678_v61 = vxor.u32 2147483648, %v2241_v4  ;;  %vm1502_vm10 = vweird.f32 %v3172_v17 }
 0x13a   :  { %v1482_v1 = vsub.s32 32, %v1481_v52  ;;  %v1483_v0 = vshll.u32 %v1474_v10, %v1481_v52  ;;  %v1486_v33 = vsub.s32 4294967266, %v1481_v52  ;;  %v675_v10 = vxor.u32 2147483648, %v2243_v63 }
 0x13b   :  { %v672_v18 = vand.u32 3, %v671_v39  ;;  %v1504_v52 = vand.u32 3, %v1503_v37 }
 0x13c   :  { %v1484_v31 = vshrl.u32 %v1466_v20, %v1482_v1  ;;  %v1487_v25 = vadd.s32 127, %v1486_v33 }
 0x13d   :  { %vm677_vm2 = vcmp.eq.s32.totalorder %v672_v18, 2  ;;  %vm674_vm4 = vcmp.eq.s32.totalorder %v672_v18, 0  ;;  %vm673_vm6 = vcmp.lt.s32.totalorder %v672_v18, 2  ;;  %vm1509_vm13 = vcmp.eq.s32.totalorder %v1504_v52, 2 }
 0x13e   :  { %v1485_v32 = vor.u32 %v1484_v31, %v1483_v0  ;;  %v1488_v30 = vshll.u32 %v1487_v25, 23  ;;  %v2245_v45 = vpop.eup %2244  ;;  %v679_v48 = vsel %vm677_vm2, %v678_v61, %v2243_v63  ;;  %v676_v42 = vsel %vm674_vm4, %v2241_v4, %v675_v10 }
 0x13f   :  { %v2247_v8 = vpop.eup %2246  ;;  %v1094_v44 = vxor.u32 2147483648, %v2245_v45  ;;  %v680_v55 = vsel %vm673_vm6, %v676_v42, %v679_v48  ;;  %vm1506_vm11 = vcmp.eq.s32.totalorder %v1504_v52, 0  ;;  %vm1505_vm14 = vcmp.lt.s32.totalorder %v1504_v52, 2  ;;  %v2080_v52 = vpop.f32.mrb[0].mxu0 }
 0x140   :  { %v1489_v43 = vor.u32 4788187, %v1488_v30  ;;  %v1492_v34 = vcvt.s32.f32 %v1485_v32  ;;  %v1091_v3 = vxor.u32 2147483648, %v2247_v8  ;;  %v681_v20 = vsel %vm670_vm8, nan, %v680_v55 }
 0x141   :  { %v1095_v47 = vsel %vm1093_vm15, %v1094_v44, %v2247_v8  ;;  %v1517_v12 = vmul.f32 %v681_v20, %v681_v20  ;;  %v1641_v48 = vsel %vm1578_vm12, %v3340_v56, 0.0  ;;  %v1635_v42 = vsel %vm1578_vm12, %v3298_v60, 0.0 }
 0x142   :  { %v1490_v15 = vand.u32 2147483647, %v1489_v43  ;;  %v1092_v22 = vsel %vm1090_vm5, %v2245_v45, %v1091_v3  ;;  %v1601_v3 = vsel %vm1578_vm12, %v3320_v53, 0.0  ;;  %v1621_v53 = vsel %vm1578_vm12, %v3335_v23, 0.0 }
 0x143   :  { %v1096_v59 = vsel %vm1089_vm7, %v1092_v22, %v1095_v47  ;;  %v1529_v39 = vmul.f32 0.28144774, %v1517_v12  ;;  %v1658_v56 = vsel %vm1578_vm12, %v3317_v2, 0.0  ;;  %v1638_v23 = vsel %vm1578_vm12, %v3309_v21, 0.0  ;;  %v118_v12 = vpop.f32.mrb[1].mxu0 }
 0x144   :  { %v1493_v57 = vmul.f32 %v1492_v34, %v1490_v15  ;;  %v1097_v27 = vsel %vm1086_vm9, nan, %v1096_v59  ;;  %v1678_v22 = vsel %vm1578_vm12, %v3326_v9, 0.0  ;;  %v1681_v60 = vsel %vm1578_vm12, %v3365_v11, 0.0 }
 0x145   :  { %v1521_v1 = vmul.f32 %v1097_v27, %v1097_v27  ;;  %v1701_v21 = vsel %vm1578_vm12, %v3384_v38, 0.0  ;;  %v1675_v9 = vsel %vm1578_vm12, %v3330_v29, 0.0  ;;  %v1718_v11 = vsel %vm1578_vm12, %v3388_v46, 0.0  ;;  %v19_v46 = vld [vmem:[%s3583_s2 + $0x8] sm:$0xff] }
 0x146   :  { %v1494_v51 = vxor.u32 2147483648, %v1493_v57  ;;  %v1695_v38 = vsel %vm1578_vm12, %v3344_v35, 0.0  ;;  %v1721_v29 = vsel %vm1578_vm12, %v3395_v49, 0.0  ;;  %v1698_v55 = vsel %vm1578_vm12, %v3348_v16, 0.0  ;;  %v20_v35 = vld [vmem:[%s3583_s2 + $0x10] sm:$0xff] }
 0x147   :  { %v1533_v32 = vmul.f32 0.28144774, %v1521_v1  ;;  %v2117_v27 = vpack.c.bf16 %v20_v35, %v19_v46  ;;  %v3486_v16 = vld [vmem:[%s3584_s3] ss:$0 sm:$0xff]  ;;  %v21_v1 = vld [vmem:[%s3583_s2 + $0x18] sm:$0xff]  ;;  %vm152_vm2 = vcmask 261120  }
 0x148   :  { %v1495_v62 = vsel %vm1412_vm3, %v1494_v51, %v1493_v57  ;;  %v1618_v51 = vsel %vm1578_vm12, %v3294_v13, 0.0  ;;  %vm1731_vm5 = vcmask 7168   ;;  %vm1736_vm15 = vcmask 15360  }
 0x149   :  { %v1498_v58 = vsel %vm3412_vm1, %v3172_v17, %v1495_v62  ;;  %v1537_v43 = vadd.f32 %v1533_v32, %v1529_v39  ;;  %v265_v17 = vld [vmem:[%s3582_s1 + $0x78] sm:$0xff]  ;;  %2118 = vmatprep.subr.bf16.mxu1 %v2117_v27  ;;  %vm1741_vm6 = vcmask 23552   ;;  %vm1746_vm7 = vcmask 31744  }
 0x14a   :  { %2248 = vcosq.f32 %v1498_v58  ;;  %2120 = vmatpush3.bf16.msra.mxu1 %v2117_v27  ;;  %vm1751_vm8 = vcmask 39936   ;;  %vm1756_vm9 = vcmask 48128  }
 0x14b   :  { %2250 = vsinq.f32 %v1498_v58 }
 0x154   :  { %v2249_v0 = vpop.eup %2248 }
 0x155   :  { %v2251_v33 = vpop.eup %2250  ;;  %v1510_v7 = vxor.u32 2147483648, %v2249_v0 }
 0x156   :  { %v1507_v31 = vxor.u32 2147483648, %v2251_v33 }
 0x157   :  { %v1511_v25 = vsel %vm1509_vm13, %v1510_v7, %v2251_v33  ;;  %v119_v33 = vadd.f32 %v3486_v16, %v118_v12  ;;  %vm1761_vm13 = vcmask 56320  }
 0x158   :  { %v1508_v30 = vsel %vm1506_vm11, %v2249_v0, %v1507_v31  ;;  %v22_v0 = vld [vmem:[%s3583_s2 + $0x20] sm:$0xff]  ;;  %v124_v31 = vadd.f32 %v2080_v52, %v3486_v16  ;;  %vm1896_vm11 = vcmask 1040384  }
 0x159   :  { %v1512_v14 = vsel %vm1505_vm14, %v1508_v30, %v1511_v25  ;;  %v2121_v7 = vpack.c.bf16 %v22_v0, %v21_v1  ;;  %v2083_v25 = vpop.f32.mrb[2].mxu0  ;;  %v141_v39 = vmul.f32 0.2, %v119_v33  ;;  %vm137_vm1 = vcmp.gt.f32.partialorder %v119_v33, 0.0 }
 0x15a   :  { %v1513_v26 = vsel %vm1502_vm10, nan, %v1512_v14  ;;  %v142_v32 = vmul.f32 0.2, %v124_v31  ;;  %v128_v30 = vpop.f32.mrb[3].mxu0  ;;  %vm1975_vm14 = vcmask 9216  }
 0x15b   :  { %v1525_v4 = vmul.f32 %v1513_v26, %v1513_v26  ;;  %2122 = vmatprep.subr.bf16.mxu1 %v2121_v7  ;;  %v129_v14 = vadd.f32 %v3486_v16, %v128_v30  ;;  %v145_v26 = vsel %vm137_vm1, %v119_v33, %v141_v39 }
 0x15c   :  { %2124 = vmatpush3.bf16.msra.mxu1 %v2121_v7  ;;  %2092 = vmatprep.mubr.msk.f32.mxu1 %vm152_vm2, %v145_v26 }
 0x15d   :  { %v1541_v34 = vmul.f32 0.28144774, %v1525_v4  ;;  %v134_v4 = vadd.f32 %v2083_v25, %v3486_v16  ;;  %vm139_vm3 = vcmp.gt.f32.partialorder %v129_v14, 0.0 }
 0x15f   :  { %v1545_v63 = vadd.f32 %v1541_v34, %v1537_v43  ;;  %v143_v34 = vmul.f32 0.2, %v129_v14  ;;  %vm140_vm4 = vcmp.gt.f32.partialorder %v134_v4, 0.0 }
 0x161   :  { %v1549_v18 = vmul.f32 -8.0, %v1545_v63  ;;  %v1569_v45 = vmul.f32 2.0, %v1545_v63 }
 0x163   :  { %v1553_v15 = vmul.f32 %v1549_v18, %v1545_v63  ;;  %v1576_v24 = vmul.f32 1.442695, %v1569_v45  ;;  %v144_v63 = vmul.f32 0.2, %v134_v4  ;;  %v147_v18 = vsel %vm139_vm3, %v129_v14, %v143_v34  ;;  %v23_v45 = vld [vmem:[%s3583_s2 + $0x28] sm:$0xff] }
 0x164   :  { %2098 = vmatprep.subr.mxu0 %v23_v45 }
 0x165   :  { %v1560_v8 = vmul.f32 1.442695, %v1553_v15  ;;  %2252 = vpow2.f32 %v1576_v24  ;;  %v148_v15 = vsel %vm140_vm4, %v134_v4, %v144_v63  ;;  %2099 = vmatpush3.msra.mxu0 %v23_v45  ;;  %v1584_v24 = vpop.xlane.xlu0 %1583 }
 0x167   :  { %2254 = vpow2.f32 %v1560_v8 }
 0x16f   :  { %v2253_v6 = vpop.eup %2252 }
 0x171   :  { %v2255_v5 = vpop.eup %2254 }
 0x172   :  { %v1565_v57 = vmul.f32 %v2255_v5, %v265_v17 }
 0x174   :  { %v1588_v10 = vsel %vm1578_vm12, %v1565_v57, 0.0  ;;  %v1594_v61 = vmul.f32 %v2253_v6, %v1565_v57 }
 0x175   :  { %1589 = vadd.xlane.f32.xlu1 %v1588_v10 }
 0x176   :  { %v1604_v44 = vsel %vm1578_vm12, %v1594_v61, 0.0  ;;  %v1614_v62 = vmul.f32 %v2253_v6, %v1594_v61 }
 0x177   :  { %1605 = vadd.xlane.f32.xlu0 %v1604_v44 }
 0x178   :  { %v1634_v58 = vmul.f32 %v2253_v6, %v1614_v62  ;;  %v1624_v13 = vsel %vm1578_vm12, %v1614_v62, 0.0 }
 0x179   :  { %1602 = vadd.xlane.f32.xlu1 %v1601_v3 }
 0x17a   :  { %v1644_v40 = vsel %vm1578_vm12, %v1634_v58, 0.0  ;;  %v1654_v47 = vmul.f32 %v2253_v6, %v1634_v58 }
 0x17b   :  { %1619 = vadd.xlane.f32.xlu0 %v1618_v51 }
 0x17c   :  { %v1664_v2 = vsel %vm1578_vm12, %v1654_v47, 0.0  ;;  %v1674_v37 = vmul.f32 %v2253_v6, %v1654_v47 }
 0x17d   :  { %1616 = vadd.xlane.f32.xlu1 %v1615_v41 }
 0x17e   :  { %v1684_v19 = vsel %vm1578_vm12, %v1674_v37, 0.0  ;;  %v1694_v50 = vmul.f32 %v2253_v6, %v1674_v37 }
 0x17f   :  { %1642 = vadd.xlane.f32.xlu0 %v1641_v48 }
 0x180   :  { %v1704_v59 = vsel %vm1578_vm12, %v1694_v50, 0.0  ;;  %v1714_v20 = vmul.f32 %v2253_v6, %v1694_v50  ;;  %v1581_v6 = vpop.xlane.xlu1 %1580 }
 0x181   :  { %1622 = vadd.xlane.f32.xlu1 %v1621_v53 }
 0x182   :  { %v1724_v49 = vsel %vm1578_vm12, %v1714_v20, 0.0  ;;  %vm138_vm12 = vcmp.gt.f32.partialorder %v124_v31, 0.0 }
 0x183   :  { %1645 = vadd.xlane.f32.xlu0 %v1644_v40  ;;  %v146_v43 = vsel %vm138_vm12, %v124_v31, %v142_v32 }
 0x184   :  { %2093 = vmatmul.mubr.msk.f32.vlgmr.msra.gmra.mrb[0].mxu1 %vm152_vm2, %v146_v43 }
 0x185   :  { %1625 = vadd.xlane.f32.xlu1 %v1624_v13  ;;  %2095 = vmatprep.mubr.msk.f32.mxu1 %vm152_vm2, %v147_v18 }
 0x187   :  { %1656 = vadd.xlane.f32.xlu0 %v1655_v54 }
 0x188   :  { %2096 = vmatmul.mubr.msk.f32.gmra.mrb[2].mxu1 %vm152_vm2, %v148_v15 }
 0x189   :  { %1636 = vadd.xlane.f32.xlu1 %v1635_v42 }
 0x18b   :  { %1659 = vadd.xlane.f32.xlu0 %v1658_v56 }
 0x18d   :  { %1639 = vadd.xlane.f32.xlu1 %v1638_v23 }
 0x18f   :  { %1679 = vadd.xlane.f32.xlu0 %v1678_v22 }
 0x191   :  { %1662 = vadd.xlane.f32.xlu1 %v1661_v28 }
 0x193   :  { %1682 = vadd.xlane.f32.xlu0 %v1681_v60 }
 0x195   :  { %1665 = vadd.xlane.f32.xlu1 %v1664_v2 }
 0x197   :  { %1702 = vadd.xlane.f32.xlu0 %v1701_v21 }
 0x199   :  { %1676 = vadd.xlane.f32.xlu1 %v1675_v9 }
 0x19b   :  { %1716 = vadd.xlane.f32.xlu0 %v1715_v36 }
 0x19d   :  { %1685 = vadd.xlane.f32.xlu1 %v1684_v19 }
 0x19f   :  { %1719 = vadd.xlane.f32.xlu0 %v1718_v11 }
 0x1a1   :  { %1696 = vadd.xlane.f32.xlu1 %v1695_v38 }
 0x1a3   :  { %1722 = vadd.xlane.f32.xlu0 %v1721_v29 }
 0x1a5   :  { %1699 = vadd.xlane.f32.xlu1 %v1698_v55 }
 0x1a9   :  { %1705 = vadd.xlane.f32.xlu1 %v1704_v59 }
 0x1ad   :  { %1725 = vadd.xlane.f32.xlu1 %v1724_v49 }
 0x1b9   :  { %149 = vrot.lane.b32.xlu0 %v3486_v16, %s2287_s15 }
 0x1ba   :  { %v1587_v8 = vpop.xlane.xlu0 %1586 }
 0x1be   :  { %1871 = vrot.lane.b32.xlu1 %v3486_v16, %s2288_s16  ;;  %v1597_v17 = vpop.xlane.xlu0 %1596 }
 0x1bf   :  { %v1607_v47 = vmul.f32 0.8824969, %v1597_v17 }
 0x1c1   :  { %v1732_v11 = vsel %vm1731_vm5, %v1581_v6, %v1607_v47 }
 0x1c2   :  { %v1600_v5 = vpop.xlane.xlu0 %1599  ;;  %1899 = vrot.lane.b32.xlu1 %v3486_v16, %s2292_s25 }
 0x1c3   :  { %v1608_v60 = vmul.f32 0.8824969, %v1600_v5 }
 0x1c5   :  { %v1733_v38 = vsel %vm1731_vm5, %v1584_v24, %v1608_v60 }
 0x202   :  { %v3507_v57 = vpop.xlane.xlu1 %1589 }
 0x204   :  { %v3509_v10 = vpop.xlane.xlu0 %1605 }
 0x206   :  { %v1603_v61 = vpop.xlane.xlu1 %1602 }
 0x207   :  { %v1609_v21 = vmul.f32 0.8824969, %v1603_v61 }
 0x208   :  { %v1620_v3 = vpop.xlane.xlu0 %1619 }
 0x209   :  { %v1734_v59 = vsel %vm1731_vm5, %v1587_v8, %v1609_v21  ;;  %v1628_v46 = vmul.f32 0.60653067, %v1620_v3  ;;  %v1610_v8 = vmul.f32 0.8824969, %v3509_v10 }
 0x20a   :  { %v1617_v44 = vpop.xlane.xlu1 %1616 }
 0x20b   :  { %v1627_v9 = vmul.f32 0.60653067, %v1617_v44  ;;  %v1738_v26 = vsel %vm1736_vm15, %v1733_v38, %v1628_v46  ;;  %v26_v38 = vld [vmem:[%s3583_s2 + $0x40] sm:$0xff] }
 0x20c   :  { %v1643_v51 = vpop.xlane.xlu0 %1642 }
 0x20d   :  { %v1737_v20 = vsel %vm1736_vm15, %v1732_v11, %v1627_v9  ;;  %v1649_v35 = vmul.f32 0.32465246, %v1643_v51  ;;  %v2289_v11 = vmov 0.0|0.0  }
 0x20e   :  { %v1623_v41 = vpop.xlane.xlu1 %1622  ;;  %2125 = vmatprep.subr.bf16.mxu1 %v2289_v11 }
 0x20f   :  { %v1629_v29 = vmul.f32 0.60653067, %v1623_v41 }
 0x210   :  { %v3511_v62 = vpop.xlane.xlu0 %1645 }
 0x211   :  { %v1739_v25 = vsel %vm1736_vm15, %v1734_v59, %v1629_v29  ;;  %v1650_v51 = vmul.f32 0.32465246, %v3511_v62  ;;  %v27_v29 = vld [vmem:[%s3583_s2 + $0x48] sm:$0xff] }
 0x212   :  { %v3513_v48 = vpop.xlane.xlu1 %1625  ;;  %v1744_v4 = vsel %vm1741_vm6, %v1739_v25, %v1649_v35 }
 0x213   :  { %v1630_v61 = vmul.f32 0.60653067, %v3513_v48 }
 0x214   :  { %v1657_v58 = vpop.xlane.xlu0 %1656 }
 0x215   :  { %v1667_v19 = vmul.f32 0.13533528, %v1657_v58 }
 0x216   :  { %v1637_v53 = vpop.xlane.xlu1 %1636 }
 0x217   :  { %v1647_v37 = vmul.f32 0.32465246, %v1637_v53 }
 0x218   :  { %v1660_v40 = vpop.xlane.xlu0 %1659 }
 0x219   :  { %v1742_v27 = vsel %vm1741_vm6, %v1737_v20, %v1647_v37  ;;  %v1668_v33 = vmul.f32 0.13533528, %v1660_v40  ;;  %v24_v37 = vld [vmem:[%s3583_s2 + $0x30] sm:$0xff] }
 0x21a   :  { %v1640_v13 = vpop.xlane.xlu1 %1639  ;;  %v1747_v0 = vsel %vm1746_vm7, %v1742_v27, %v1667_v19 }
 0x21b   :  { %v1648_v49 = vmul.f32 0.32465246, %v1640_v13  ;;  %v1735_v13 = vsel %vm1731_vm5, %v3507_v57, %v1610_v8 }
 0x21c   :  { %v1680_v54 = vpop.xlane.xlu0 %1679  ;;  %v1740_v48 = vsel %vm1736_vm15, %v1735_v13, %v1630_v61 }
 0x21d   :  { %v1688_v39 = vmul.f32 0.043936934, %v1680_v54  ;;  %v1743_v63 = vsel %vm1741_vm6, %v1738_v26, %v1648_v49  ;;  %v1745_v62 = vsel %vm1741_vm6, %v1740_v48, %v1650_v51 }
 0x21e   :  { %v1663_v42 = vpop.xlane.xlu1 %1662  ;;  %v1748_v17 = vsel %vm1746_vm7, %v1743_v63, %v1668_v33 }
 0x21f   :  { %v1669_v52 = vmul.f32 0.13533528, %v1663_v42  ;;  %v1753_v3 = vsel %vm1751_vm8, %v1748_v17, %v1688_v39 }
 0x220   :  { %v1683_v56 = vpop.xlane.xlu0 %1682 }
 0x221   :  { %v1689_v7 = vmul.f32 0.043936934, %v1683_v56  ;;  %v1749_v18 = vsel %vm1746_vm7, %v1744_v4, %v1669_v52 }
 0x222   :  { %v1666_v23 = vpop.xlane.xlu1 %1665 }
 0x223   :  { %v1754_v6 = vsel %vm1751_vm8, %v1749_v18, %v1689_v7  ;;  %v1670_v10 = vmul.f32 0.13533528, %v1666_v23 }
 0x224   :  { %v1703_v22 = vpop.xlane.xlu0 %1702 }
 0x225   :  { %v1709_v30 = vmul.f32 0.011108996, %v1703_v22  ;;  %v1750_v56 = vsel %vm1746_vm7, %v1745_v62, %v1670_v10 }
 0x226   :  { %v1677_v28 = vpop.xlane.xlu1 %1676 }
 0x227   :  { %v1687_v55 = vmul.f32 0.043936934, %v1677_v28  ;;  %v1759_v44 = vsel %vm1756_vm9, %v1754_v6, %v1709_v30 }
 0x228   :  { %v1717_v2 = vpop.xlane.xlu0 %1716 }
 0x229   :  { %v1727_v1 = vmul.f32 0.0021874912, %v1717_v2  ;;  %v1752_v32 = vsel %vm1751_vm8, %v1747_v0, %v1687_v55  ;;  %v2129_v55 = vpack.c.bf16 %v27_v29, %v26_v38 }
 0x22a   :  { %v1686_v36 = vpop.xlane.xlu1 %1685 }
 0x22b   :  { %v1690_v54 = vmul.f32 0.043936934, %v1686_v36  ;;  %v25_v36 = vld [vmem:[%s3583_s2 + $0x38] sm:$0xff]  ;;  %s2293_s2 = smov [#allocation2]  }
 0x22c   :  { %v1720_v50 = vpop.xlane.xlu0 %1719  ;;  %v2126_v19 = vpack.c.bf16 %v25_v36, %v24_v37  ;;  %s1983_s26 = sshll.u32 %s2293_s2, 4  ;;  %s1984_s26 = int_to_ptr.vmem [resolvable:$true] %s1983_s26 }
 0x22d   :  { %v1728_v15 = vmul.f32 0.0021874912, %v1720_v50  ;;  %v1755_v23 = vsel %vm1751_vm8, %v1750_v56, %v1690_v54  ;;  %v2291_v50 = vmov 0.0   ;;  %s2257_s27 = scalar_lea.vmem %s1984_s26, 32  ;;  %p2262_p1 = scmp.lt.s32.totalorder %s1984_s26, %s1984_s26 }
 0x22e   :  { %v1697_v12 = vpop.xlane.xlu1 %1696  ;;  %2127 = vmatpush3.bf16.msra.mxu1 %v2126_v19  ;;  %p2258_p0 = scmp.ne.s32.totalorder %s1984_s26, %s2257_s27  ;;  %p2263_p2 = scmp.lt.s32.totalorder %s2257_s27, %s2257_s27 }
 0x22f   :  { %v1707_v31 = vmul.f32 0.011108996, %v1697_v12  ;;  %2128 = vmatprep.subr.bf16.mxu1 %v2289_v11 }
 0x230   :  { %v1723_v14 = vpop.xlane.xlu0 %1722  ;;  %p2264_p3 = por %p2263_p2, %p2262_p1 }
 0x231   :  { %v1757_v43 = vsel %vm1756_vm9, %v1752_v32, %v1707_v31  ;;  %v1729_v34 = vmul.f32 0.0021874912, %v1723_v14 }
 0x232   :  { %v1700_v45 = vpop.xlane.xlu1 %1699  ;;  %v1762_v24 = vsel %vm1761_vm13, %v1757_v43, %v1727_v1  ;;  %2130 = vmatpush3.bf16.msra.mxu1 %v2129_v55  ;;  %p2265_p4 = pnand %p2264_p3, %p2258_p0 }
 0x233   :  { %v1708_v5 = vmul.f32 0.011108996, %v1700_v45  ;;  %2100 = vmatprep.mubr.msk.f32.mxu0 %vm39_vm0, %v1762_v24  ;;  %v1764_v58 = vsel %vm1761_vm13, %v1759_v44, %v1729_v34 }
 0x234   :  { %v150_v59 = vpop.permute.xlu0 %149 }
 0x235   :  { %v1758_v41 = vsel %vm1756_vm9, %v1753_v3, %v1708_v5 }
 0x236   :  { %v1763_v53 = vsel %vm1761_vm13, %v1758_v41, %v1728_v15  ;;  %v1706_v40 = vpop.xlane.xlu1 %1705 }
 0x237   :  { %2101 = vmatmul.mubr.msk.f32.vlgmr.msra.gmra.mrb[4].mxu0 %vm39_vm0, %v1763_v53  ;;  %v1710_v42 = vmul.f32 0.011108996, %v1706_v40 }
 0x238   :  { %2103 = vmatprep.mubr.msk.f32.mxu0 %vm39_vm0, %v1764_v58 }
 0x239   :  { %v1760_v47 = vsel %vm1756_vm9, %v1755_v23, %v1710_v42 }
 0x23a   :  { %v1726_v22 = vpop.xlane.xlu1 %1725 }
 0x23b   :  { %v1730_v28 = vmul.f32 0.0021874912, %v1726_v22 }
 0x23d   :  { %v1765_v57 = vsel %vm1761_vm13, %v1760_v47, %v1730_v28 }
 0x23e   :  { %2104 = vmatmul.mubr.msk.f32.gmra.mrb[6].mxu0 %vm39_vm0, %v1765_v57  ;;  %vm2290_vm0 = vmmov 0   ;;  %v1872_v52 = vpop.permute.xlu1 %1871 }
 0x23f   :  { %2114 = vmatprep.mubr.msk.f32.mxu1 %vm2290_vm0, %v2291_v50 }
 0x242   :  { %v1900_v54 = vpop.permute.xlu1 %1899 }
 0x257   :  { %v2094_v60 = vpop.f32.mrb[0].mxu1 }
 0x258   :  { %v231_v2 = vpop.f32.mrb[1].mxu1  ;;  %v237_v20 = vadd.f32 %v2094_v60, %v150_v59 }
 0x259   :  { %v232_v46 = vadd.f32 %v231_v2, %v150_v59 }
 0x25a   :  { %v1767_v35 = vmul.f32 16.0, %v237_v20 }
 0x25b   :  { %v2097_v21 = vpop.f32.mrb[2].mxu1  ;;  %v1766_v27 = vmul.f32 16.0, %v232_v46 }
 0x25c   :  { %v241_v9 = vpop.f32.mrb[3].mxu1  ;;  %v247_v0 = vadd.f32 %v2097_v21, %v150_v59 }
 0x25d   :  { %v242_v7 = vadd.f32 %v241_v9, %v150_v59 }
 0x25e   :  { %v1769_v32 = vmul.f32 16.0, %v247_v0 }
 0x25f   :  { %v1768_v16 = vmul.f32 16.0, %v242_v7 }
 0x30a   :  { %v2102_v49 = vpop.f32.mrb[4].mxu0 }
 0x30b   :  { %v1868_v12 = vadd.f32 %v2102_v49, %v1767_v35  ;;  %v1848_v1 = vpop.f32.mrb[5].mxu0 }
 0x30c   :  { %v1867_v33 = vadd.f32 %v1848_v1, %v1766_v27 }
 0x30d   :  { %v1875_v31 = vadd.f32 %v1872_v52, %v1868_v12 }
 0x30e   :  { %v1874_v25 = vadd.f32 %v1872_v52, %v1867_v33 }
 0x30f   :  { %v1879_v39 = vsel %vm152_vm2, %v1875_v31, 0.0 }
 0x310   :  { %v1878_v30 = vsel %vm152_vm2, %v1874_v25, 0.0 }
 0x311   :  { %v1880_v14 = vadd.f32 %v1879_v39, %v1878_v30  ;;  %v2105_v26 = vpop.f32.mrb[6].mxu0 }
 0x312   :  { %v1870_v4 = vadd.f32 %v2105_v26, %v1769_v32  ;;  %v1858_v43 = vpop.f32.mrb[7].mxu0 }
 0x313   :  { %v1881_v34 = vrot.slane %v1880_v14, 4  ;;  %v1869_v63 = vadd.f32 %v1858_v43, %v1768_v16 }
 0x314   :  { %v1877_v18 = vadd.f32 %v1872_v52, %v1870_v4 }
 0x315   :  { %v1882_v45 = vadd.f32 %v1881_v34, %v1880_v14  ;;  %v1876_v15 = vadd.f32 %v1872_v52, %v1869_v63 }
 0x316   :  { %v1888_v24 = vsel %vm152_vm2, %v1877_v18, 0.0 }
 0x317   :  { %v1887_v8 = vsel %vm152_vm2, %v1876_v15, 0.0  ;;  %v1883_v17 = vrot.slane %v1882_v45, 2 }
 0x318   :  { %v1889_v6 = vadd.f32 %v1888_v24, %v1887_v8 }
 0x319   :  { %v1884_v61 = vadd.f32 %v1883_v17, %v1882_v45 }
 0x31a   :  { %v1890_v5 = vrot.slane %v1889_v6, 4 }
 0x31b   :  { %v1885_v51 = vrot.slane %v1884_v61, 1 }
 0x31c   :  { %v1891_v3 = vadd.f32 %v1890_v5, %v1889_v6 }
 0x31d   :  { %v1886_v10 = vadd.f32 %v1885_v51, %v1884_v61 }
 0x31e   :  { %v1892_v44 = vrot.slane %v1891_v3, 2 }
 0x320   :  { %v1893_v41 = vadd.f32 %v1892_v44, %v1891_v3 }
 0x322   :  { %v1894_v58 = vrot.slane %v1893_v41, 1 }
 0x324   :  { %v1895_v53 = vadd.f32 %v1894_v58, %v1893_v41 }
 0x326   :  { %v1897_v40 = vsel %vm1896_vm11, %v1886_v10, %v1895_v53 }
 0x327   :  { %v1898_v13 = vmul.f32 0.0625, %v1897_v40 }
 0x329   :  { %2115 = vmatmul.mubr.msk.f32.vlgmr.msra.gmra.mrb[4].mxu1 %vm152_vm2, %v1898_v13 }
 0x3fc   :  { %v1971_v48 = vpop.f32.mrb[4].mxu1 }
 0x3fd   :  { %v1972_v42 = vadd.f32 %v1971_v48, %v1900_v54  ;;  %v2116_v62 = vpop.f32.mrb[5].mxu1 }
 0x3ff   :  { %1976 = vst.msk [vmem:[#allocation2] sm:$0x3] %vm1975_vm14, %v1972_v42 }
 0x400   :  { %2268 = shalt.err (!%p2265_p4)
}
 0x401   :  { %s2269_s30 = scalar_lea.hbm %s3585_s4, 32 }
 0x402   :  { %p2270_p5 = scmp.ne.s32.totalorder %s3585_s4, %s2269_s30  ;;  %p2273_p6 = scmp.lt.u32.totalorder %s2269_s30, %s3585_s4 }
 0x404   :  { %p2275_p7 = pnand %p2273_p6, %p2270_p5 }
 0x406   :  { %2278 = shalt.err (!%p2275_p7)
}
 0x407   :  { %1986 = dma.vmem_to_hbm [thread:$0]  %s1984_s26, 32, %s3585_s4, [#allocation3]  }
 0x408   :  { %2279 = dma.done.wait [#allocation3], 32  }
 0x409   :  { %2280 = vsyncadd [#allocation3], 4294967264 }
 0x40a   :  { %1990 = vsyncpa [#allocation3], 1 }

</bundles_post_ra>
